<compile_context>
chip_gen: v7x
topology: tpu7x:2x2x1
jax: 0.10.0
libtpu: 0.0.40
codegen_flags: <defaults>
</compile_context>

<pallas_src>
import math

import jax
import jax.numpy as jnp
from jax.experimental import pallas as pl
from jax.experimental.pallas import tpu as pltpu

OMEGA_0 = 30.0
HIDDEN_FEATURES = (256, 256, 256, 256, 256)  # Siren(hidden_features=[256]*5, hidden_layers=4)
LANE = 128
SUBLANE = 8


def _round_up(x, m):
    return (x + m - 1) // m * m


def _choose_tm(m_rows, tm_max):
    """Row-tile size: as large as tm_max, but guarantee >= 2 grid steps whenever
    there are at least 2*SUBLANE padded rows so the 'parallel' batch axis can
    shard across v7x's two TensorCores."""
    m8 = _round_up(m_rows, SUBLANE)
    if m8 >= 2 * SUBLANE:
        tm = min(tm_max, _round_up(pl.cdiv(m8, 2), SUBLANE))
    else:
        tm = m8
    return max(tm, SUBLANE)


# --------------------------------------------------------------------------- #
# Kernel: whole Siren MLP (6 matmuls + 5 sines) for one (tm, in_pad) row tile  #
# --------------------------------------------------------------------------- #
def siren_mlp_kernel(x_ref, w0_ref, wh_ref, w5_ref, b_ref, o_ref):
    """x_ref:  (tm, in_pad)        f32 activations
       w0_ref: (in_pad, hidden)    first-layer weight (omega_0 pre-folded)
       wh_ref: (n_hidden, h, h)    stacked hidden weights (omega_0 pre-folded)
       w5_ref: (hidden, out_pad)   outermost linear weight
       b_ref:  (n_layers, BW)      f32 biases (rows 0..n-2 pre-scaled by omega_0)
       o_ref:  (tm, out_pad)       f32 output
    Weights may be bf16; MXU accumulates in f32; bias add / sin stay f32."""
    hidden = w0_ref.shape[-1]
    n_hidden = wh_ref.shape[0]
    out_w = o_ref.shape[-1]

    h = x_ref[...]  # f32

    # First SineLayer (omega_0 already folded into w0 / b row 0).
    z = jnp.dot(h.astype(w0_ref.dtype), w0_ref[...],
                preferred_element_type=jnp.float32) + b_ref[0:1, 0:hidden]
    h = jnp.sin(z)

    # Hidden SineLayers (omega_0 folded) — short fixed unrolled loop.
    for li in range(n_hidden):
        z = jnp.dot(h.astype(wh_ref.dtype), wh_ref[li],
                    preferred_element_type=jnp.float32) + b_ref[li + 1:li + 2, 0:hidden]
        h = jnp.sin(z)

    # Outermost linear layer (no omega, no sine).
    o_ref[...] = (jnp.dot(h.astype(w5_ref.dtype), w5_ref[...],
                          preferred_element_type=jnp.float32)
                  + b_ref[n_hidden + 1:n_hidden + 2, 0:out_w])


# --------------------------------------------------------------------------- #
# Parameter init (Siren-style, deterministic)                                  #
# --------------------------------------------------------------------------- #
def init_siren_params(key, in_features, hidden_features, out_features, omega_0=OMEGA_0):
    """First layer: U(-1/fan_in, 1/fan_in); others: U(-sqrt(6/fan_in)/w0, +).
    Biases: PyTorch nn.Linear default U(-1/sqrt(fan_in), 1/sqrt(fan_in)).
    Weights stored (fan_in, fan_out), f32 master copies."""
    dims = [in_features] + list(hidden_features) + [out_features]
    params = []
    for li in range(len(dims) - 1):
        fan_in, fan_out = dims[li], dims[li + 1]
        key, kw, kb = jax.random.split(key, 3)
        w_bound = (1.0 / fan_in) if li == 0 else math.sqrt(6.0 / fan_in) / omega_0
        w = jax.random.uniform(kw, (fan_in, fan_out), jnp.float32, -w_bound, w_bound)
        b_bound = 1.0 / math.sqrt(fan_in)
        b = jax.random.uniform(kb, (1, fan_out), jnp.float32, -b_bound, b_bound)
        params.append((w, b))
    return params


# --------------------------------------------------------------------------- #
# Operand prep (wrapper glue: omega fold, padding, stacking, dtype cast)       #
# --------------------------------------------------------------------------- #
def _prepare_operands(params, out_features, in_pad, out_pad, param_dtype):
    n_layers = len(params)
    hidden = params[0][0].shape[1]
    bw = max(hidden, out_pad)

    # Fold omega_0 into the f32 master weights/biases of every SineLayer
    # (layers 0..n-2) BEFORE the bf16 cast (avoids double rounding).
    w0 = params[0][0].astype(jnp.float32) * OMEGA_0
    w0 = jnp.pad(w0, ((0, in_pad - w0.shape[0]), (0, 0))).astype(param_dtype)

    wh = jnp.stack([params[i][0].astype(jnp.float32) * OMEGA_0
                    for i in range(1, n_layers - 1)], axis=0).astype(param_dtype)

    w5 = params[-1][0].astype(jnp.float32)
    w5 = jnp.pad(w5, ((0, 0), (0, out_pad - out_features))).astype(param_dtype)

    rows = []
    for li, (_, b) in enumerate(params):
        bb = jnp.asarray(b, jnp.float32).reshape(1, -1)
        if li < n_layers - 1:
            bb = bb * OMEGA_0
        rows.append(jnp.pad(bb, ((0, 0), (0, bw - bb.shape[1]))))
    b_stack = jnp.concatenate(rows, axis=0)  # (n_layers, bw), f32 biases

    return w0, wh, w5, b_stack


# --------------------------------------------------------------------------- #
# Batched driver: M stacked module calls -> one pallas_call, resident weights  #
# --------------------------------------------------------------------------- #
def mp_forward_batched(x_rows, params, out_features, *,
                       param_dtype=jnp.bfloat16, tm=512):
    """Run the Siren MLP on M stacked flattened inputs (M, in_features).
    Returns (M, out_features)."""
    x_rows = jnp.asarray(x_rows, jnp.float32)
    M, in_features = x_rows.shape
    n_layers = len(params)
    hidden = params[0][0].shape[1]

    in_pad = _round_up(in_features, LANE)     # lane-dense x load / full-K layer 0
    out_pad = _round_up(out_features, LANE)   # lane-dense output store
    tm = _choose_tm(M, tm)
    Mp = _round_up(M, tm)
    grid = (Mp // tm,)

    x_p = jnp.pad(x_rows, ((0, Mp - M), (0, in_pad - in_features)))
    w0, wh, w5, b_stack = _prepare_operands(params, out_features, in_pad, out_pad,
                                            param_dtype)

    in_specs = [
        pl.BlockSpec((tm, in_pad), lambda i: (i, 0)),
        # Constant block index for every grid step -> weights DMA'd once,
        # VMEM resident across the whole batch axis.
        pl.BlockSpec(w0.shape, lambda i: (0, 0)),
        pl.BlockSpec(wh.shape, lambda i: (0, 0, 0)),
        pl.BlockSpec(w5.shape, lambda i: (0, 0)),
        pl.BlockSpec(b_stack.shape, lambda i: (0, 0)),
    ]
    out_specs = pl.BlockSpec((tm, out_pad), lambda i: (i, 0))

    weight_bytes = sum(int(a.size) * a.dtype.itemsize for a in (w0, wh, w5, b_stack))
    flops = 2 * Mp * (in_pad * hidden
                      + (n_layers - 2) * hidden * hidden
                      + hidden * out_pad)
    cost = pl.CostEstimate(
        flops=flops,
        transcendentals=Mp * hidden * (n_layers - 1),
        bytes_accessed=weight_bytes + Mp * (in_pad + out_pad) * 4)

    # VMEM budget: (double-buffered) resident weights + pipelined x/out tiles
    # + in-kernel f32 intermediates (h/z/bf16 staging) + Mosaic scratch headroom.
    vmem_limit = int(min(
        2 * weight_bytes
        + 2 * tm * (in_pad + out_pad) * 4
        + 4 * tm * max(hidden, out_pad) * 4
        + (8 << 20),
        32 << 20))

    y = pl.pallas_call(
        siren_mlp_kernel,
        out_shape=jax.ShapeDtypeStruct((Mp, out_pad), jnp.float32),
        grid=grid,
        in_specs=in_specs,
        out_specs=out_specs,
        cost_estimate=cost,
        compiler_params=pltpu.CompilerParams(
            dimension_semantics=("parallel",),   # batch tiles shard across TCs (v7x)
            vmem_limit_bytes=vmem_limit,
        ),
    )(x_p, w0, wh, w5, b_stack)

    return y[:M, :out_features]


def mp_forward(x, params, out_features, *, param_dtype=jnp.bfloat16):
    """Exact mp.forward semantics: x.view(1, -1) -> Siren -> .view(-1, 1)."""
    x_flat = jnp.asarray(x, jnp.float32).reshape(1, -1)
    y = mp_forward_batched(x_flat, params, out_features, param_dtype=param_dtype)
    return y.reshape(-1, 1)


# --------------------------------------------------------------------------- #
# Pure-JAX references                                                          #
# --------------------------------------------------------------------------- #
def siren_reference_rows(x_rows, params, param_dtype=jnp.float32, fold_omega=False):
    """fold_omega=False: original semantics sin(30*(hW+b)).
       fold_omega=True : mimics the kernel's arithmetic (omega folded into the
       f32 master weights before the param_dtype cast) — for bf16 comparisons."""
    h = jnp.asarray(x_rows, jnp.float32)
    n = len(params)
    for i, (w, b) in enumerate(params):
        w = jnp.asarray(w, jnp.float32)
        b = jnp.asarray(b, jnp.float32)
        is_sine = i < n - 1
        if fold_omega and is_sine:
            w = w * OMEGA_0
            b = b * OMEGA_0
        z = jnp.dot(h.astype(param_dtype), w.astype(param_dtype),
                    preferred_element_type=jnp.float32) + b
        h = jnp.sin(z if fold_omega else OMEGA_0 * z) if is_sine else z
    return h


def mp_reference(x, params, param_dtype=jnp.float32):
    rows = jnp.asarray(x, jnp.float32).reshape(1, -1)
    return siren_reference_rows(rows, params, param_dtype).reshape(-1, 1)


if __name__ == "__main__":
    in_features = 32
    out_features = 16

    key = jax.random.PRNGKey(0)
    k_param, k_x, k_xs = jax.random.split(key, 3)

    params = init_siren_params(k_param, in_features, HIDDEN_FEATURES, out_features)

    # Single module call: any shape with in_features elements (mp does x.view(1, -1)).
    x = jax.random.normal(k_x, (2, 16), dtype=jnp.float32)

    # 1) Strict check: f32-weight kernel (with omega folded) vs the ORIGINAL
    #    semantics reference sin(30*(hW+b)) — validates the fold and the kernel.
    out_f32 = jax.block_until_ready(
        mp_forward(x, params, out_features, param_dtype=jnp.float32))
    ref_f32 = mp_reference(x, params, jnp.float32)
    assert out_f32.shape == (out_features, 1), out_f32.shape
    assert jnp.allclose(out_f32, ref_f32, atol=5e-4, rtol=5e-4), \
        float(jnp.max(jnp.abs(out_f32 - ref_f32)))

    # 2) Default perf path: bf16 weights, compared against a bf16-consistent
    #    folded reference (sin(30*.) amplifies bf16 rounding vs pure f32).
    out_bf16 = jax.block_until_ready(mp_forward(x, params, out_features))
    ref_bf16 = siren_reference_rows(x.reshape(1, -1), params, jnp.bfloat16,
                                    fold_omega=True).reshape(-1, 1)
    assert out_bf16.shape == (out_features, 1), out_bf16.shape
    assert jnp.allclose(out_bf16, ref_bf16, atol=2e-2, rtol=2e-2)

    # 3) Batched path: 64 stacked module invocations share one kernel launch;
    #    tm collapses to 32 so grid=(2,) and both v7x TensorCores get work.
    xs = jax.random.normal(k_xs, (64, in_features), dtype=jnp.float32)
    out_b = jax.block_until_ready(mp_forward_batched(xs, params, out_features))
    ref_b = siren_reference_rows(xs, params, jnp.bfloat16, fold_omega=True)
    assert out_b.shape == (64, out_features), out_b.shape
    assert jnp.allclose(out_b, ref_b, atol=2e-2, rtol=2e-2)

    print("KERNEL_OK")
</pallas_src>

<mosaic_0001>
module attributes {stable_mosaic.version = 11 : i64} {
  func.func @siren_mlp_kernel(%arg0: i32, %arg1: memref<8x128xf32, #tpu.memory_space<vmem>>, %arg2: memref<128x256xf32, #tpu.memory_space<vmem>>, %arg3: memref<4x256x256xf32, #tpu.memory_space<vmem>>, %arg4: memref<256x128xf32, #tpu.memory_space<vmem>>, %arg5: memref<6x256xf32, #tpu.memory_space<vmem>>, %arg6: memref<8x128xf32, #tpu.memory_space<vmem>>) attributes {dimension_semantics = [#tpu.dimension_semantics<parallel>], iteration_bounds = array<i64: 1>, scalar_prefetch = 0 : i64, scratch_operands = 0 : i64, tpu.core_type = #tpu.core_type<tc>, window_params = [{transform_indices = @transform_0, window_bounds = array<i64: 8, 128>}, {pipeline_mode = #tpu.pipeline_mode<synchronous>, transform_indices = @transform_1, window_bounds = array<i64: 128, 256>}, {pipeline_mode = #tpu.pipeline_mode<synchronous>, transform_indices = @transform_2, window_bounds = array<i64: 4, 256, 256>}, {pipeline_mode = #tpu.pipeline_mode<synchronous>, transform_indices = @transform_3, window_bounds = array<i64: 256, 128>}, {pipeline_mode = #tpu.pipeline_mode<synchronous>, transform_indices = @transform_4, window_bounds = array<i64: 6, 256>}, {transform_indices = @transform_5, window_bounds = array<i64: 8, 128>}]} {
    %c0 = arith.constant 0 : index
    %c0_0 = arith.constant 0 : index
    %0 = vector.load %arg1[%c0, %c0_0] : memref<8x128xf32, #tpu.memory_space<vmem>>, vector<8x128xf32>
    %c0_1 = arith.constant 0 : index
    %c0_2 = arith.constant 0 : index
    %1 = vector.load %arg2[%c0_1, %c0_2] : memref<128x256xf32, #tpu.memory_space<vmem>>, vector<128x256xf32>
    %cst = arith.constant dense<0.000000e+00> : vector<8x256xf32>
    %2 = tpu.matmul %0, %1, %cst {dimension_numbers = #tpu.dot_dimension_numbers<[1], [0], [0], [1], [0, 0, 1, 1], [], []>} : vector<8x128xf32>, vector<128x256xf32>, vector<8x256xf32> -> vector<8x256xf32>
    %c0_3 = arith.constant 0 : index
    %c0_4 = arith.constant 0 : index
    %3 = vector.load %arg5[%c0_3, %c0_4] : memref<6x256xf32, #tpu.memory_space<vmem>>, vector<1x256xf32>
    %4 = vector.broadcast %3 : vector<1x256xf32> to vector<8x256xf32>
    %5 = arith.addf %2, %4 : vector<8x256xf32>
    %6 = math.sin %5 : vector<8x256xf32>
    %c0_5 = arith.constant 0 : index
    %c0_6 = arith.constant 0 : index
    %c0_7 = arith.constant 0 : index
    %7 = vector.load %arg3[%c0_5, %c0_6, %c0_7] : memref<4x256x256xf32, #tpu.memory_space<vmem>>, vector<1x256x256xf32>
    %8 = vector.shape_cast %7 : vector<1x256x256xf32> to vector<256x256xf32>
    %cst_8 = arith.constant dense<0.000000e+00> : vector<8x256xf32>
    %9 = tpu.matmul %6, %8, %cst_8 {dimension_numbers = #tpu.dot_dimension_numbers<[1], [0], [0], [1], [0, 0, 1, 1], [], []>} : vector<8x256xf32>, vector<256x256xf32>, vector<8x256xf32> -> vector<8x256xf32>
    %c1 = arith.constant 1 : index
    %c0_9 = arith.constant 0 : index
    %10 = vector.load %arg5[%c1, %c0_9] : memref<6x256xf32, #tpu.memory_space<vmem>>, vector<1x256xf32>
    %11 = vector.broadcast %10 : vector<1x256xf32> to vector<8x256xf32>
    %12 = arith.addf %9, %11 : vector<8x256xf32>
    %13 = math.sin %12 : vector<8x256xf32>
    %c1_10 = arith.constant 1 : index
    %c0_11 = arith.constant 0 : index
    %c0_12 = arith.constant 0 : index
    %14 = vector.load %arg3[%c1_10, %c0_11, %c0_12] : memref<4x256x256xf32, #tpu.memory_space<vmem>>, vector<1x256x256xf32>
    %15 = vector.shape_cast %14 : vector<1x256x256xf32> to vector<256x256xf32>
    %cst_13 = arith.constant dense<0.000000e+00> : vector<8x256xf32>
    %16 = tpu.matmul %13, %15, %cst_13 {dimension_numbers = #tpu.dot_dimension_numbers<[1], [0], [0], [1], [0, 0, 1, 1], [], []>} : vector<8x256xf32>, vector<256x256xf32>, vector<8x256xf32> -> vector<8x256xf32>
    %c2 = arith.constant 2 : index
    %c0_14 = arith.constant 0 : index
    %17 = vector.load %arg5[%c2, %c0_14] : memref<6x256xf32, #tpu.memory_space<vmem>>, vector<1x256xf32>
    %18 = vector.broadcast %17 : vector<1x256xf32> to vector<8x256xf32>
    %19 = arith.addf %16, %18 : vector<8x256xf32>
    %20 = math.sin %19 : vector<8x256xf32>
    %c2_15 = arith.constant 2 : index
    %c0_16 = arith.constant 0 : index
    %c0_17 = arith.constant 0 : index
    %21 = vector.load %arg3[%c2_15, %c0_16, %c0_17] : memref<4x256x256xf32, #tpu.memory_space<vmem>>, vector<1x256x256xf32>
    %22 = vector.shape_cast %21 : vector<1x256x256xf32> to vector<256x256xf32>
    %cst_18 = arith.constant dense<0.000000e+00> : vector<8x256xf32>
    %23 = tpu.matmul %20, %22, %cst_18 {dimension_numbers = #tpu.dot_dimension_numbers<[1], [0], [0], [1], [0, 0, 1, 1], [], []>} : vector<8x256xf32>, vector<256x256xf32>, vector<8x256xf32> -> vector<8x256xf32>
    %c3 = arith.constant 3 : index
    %c0_19 = arith.constant 0 : index
    %24 = vector.load %arg5[%c3, %c0_19] : memref<6x256xf32, #tpu.memory_space<vmem>>, vector<1x256xf32>
    %25 = vector.broadcast %24 : vector<1x256xf32> to vector<8x256xf32>
    %26 = arith.addf %23, %25 : vector<8x256xf32>
    %27 = math.sin %26 : vector<8x256xf32>
    %c3_20 = arith.constant 3 : index
    %c0_21 = arith.constant 0 : index
    %c0_22 = arith.constant 0 : index
    %28 = vector.load %arg3[%c3_20, %c0_21, %c0_22] : memref<4x256x256xf32, #tpu.memory_space<vmem>>, vector<1x256x256xf32>
    %29 = vector.shape_cast %28 : vector<1x256x256xf32> to vector<256x256xf32>
    %cst_23 = arith.constant dense<0.000000e+00> : vector<8x256xf32>
    %30 = tpu.matmul %27, %29, %cst_23 {dimension_numbers = #tpu.dot_dimension_numbers<[1], [0], [0], [1], [0, 0, 1, 1], [], []>} : vector<8x256xf32>, vector<256x256xf32>, vector<8x256xf32> -> vector<8x256xf32>
    %c4 = arith.constant 4 : index
    %c0_24 = arith.constant 0 : index
    %31 = vector.load %arg5[%c4, %c0_24] : memref<6x256xf32, #tpu.memory_space<vmem>>, vector<1x256xf32>
    %32 = vector.broadcast %31 : vector<1x256xf32> to vector<8x256xf32>
    %33 = arith.addf %30, %32 : vector<8x256xf32>
    %34 = math.sin %33 : vector<8x256xf32>
    %c0_25 = arith.constant 0 : index
    %c0_26 = arith.constant 0 : index
    %35 = vector.load %arg4[%c0_25, %c0_26] : memref<256x128xf32, #tpu.memory_space<vmem>>, vector<256x128xf32>
    %cst_27 = arith.constant dense<0.000000e+00> : vector<8x128xf32>
    %36 = tpu.matmul %34, %35, %cst_27 {dimension_numbers = #tpu.dot_dimension_numbers<[1], [0], [0], [1], [0, 0, 1, 1], [], []>} : vector<8x256xf32>, vector<256x128xf32>, vector<8x128xf32> -> vector<8x128xf32>
    %c5 = arith.constant 5 : index
    %c0_28 = arith.constant 0 : index
    %37 = vector.load %arg5[%c5, %c0_28] : memref<6x256xf32, #tpu.memory_space<vmem>>, vector<1x128xf32>
    %38 = vector.broadcast %37 : vector<1x128xf32> to vector<8x128xf32>
    %39 = arith.addf %36, %38 : vector<8x128xf32>
    %c0_29 = arith.constant 0 : index
    %c0_30 = arith.constant 0 : index
    %40 = vector.load %arg6[%c0_29, %c0_30] : memref<8x128xf32, #tpu.memory_space<vmem>>, vector<8x128xf32>
    tpu.vector_store %arg6[%c0_29, %c0_30], %39 {strides = array<i32>} : memref<8x128xf32, #tpu.memory_space<vmem>>, vector<8x128xf32>,
    return
  }
  func.func @transform_0(%arg0: i32) -> (i32, i32) {
    %c0_i32 = arith.constant 0 : i32
    %c0_i32_0 = arith.constant 0 : i32
    return %arg0, %c0_i32 : i32, i32
  }
  func.func @transform_1(%arg0: i32) -> (i32, i32) {
    %c0_i32 = arith.constant 0 : i32
    %c0_i32_0 = arith.constant 0 : i32
    %c0_i32_1 = arith.constant 0 : i32
    return %c0_i32, %c0_i32_0 : i32, i32
  }
  func.func @transform_2(%arg0: i32) -> (i32, i32, i32) {
    %c0_i32 = arith.constant 0 : i32
    %c0_i32_0 = arith.constant 0 : i32
    %c0_i32_1 = arith.constant 0 : i32
    %c0_i32_2 = arith.constant 0 : i32
    return %c0_i32, %c0_i32_0, %c0_i32_1 : i32, i32, i32
  }
  func.func @transform_3(%arg0: i32) -> (i32, i32) {
    %c0_i32 = arith.constant 0 : i32
    %c0_i32_0 = arith.constant 0 : i32
    %c0_i32_1 = arith.constant 0 : i32
    return %c0_i32, %c0_i32_0 : i32, i32
  }
  func.func @transform_4(%arg0: i32) -> (i32, i32) {
    %c0_i32 = arith.constant 0 : i32
    %c0_i32_0 = arith.constant 0 : i32
    %c0_i32_1 = arith.constant 0 : i32
    return %c0_i32, %c0_i32_0 : i32, i32
  }
  func.func @transform_5(%arg0: i32) -> (i32, i32) {
    %c0_i32 = arith.constant 0 : i32
    %c0_i32_0 = arith.constant 0 : i32
    return %arg0, %c0_i32 : i32, i32
  }
}

</mosaic_0001>

<bundles_post_ra>
// kernel: tpu_custom_call.1
= control target key start
LH: loop header
LB: loop body
LE: loop exit
PB: predicated region body
PF: predicated region fallthrough
CT: control target
= control target key end

     0   :  { %10 = vsyncpa [#allocation3], 0  ;;  %s3158_s0 = inlined_call_operand.hbm [shape: f32[8,128], index: 0, kind: input, shape index: {}]   ;;  %s3159_s1 = inlined_call_operand.hbm [shape: f32[128,256], index: 1, kind: input, shape index: {}]   ;;  %s3160_s2 = inlined_call_operand.hbm [shape: f32[4,256,256], index: 2, kind: input, shape index: {}]   ;;  %s3161_s3 = inlined_call_operand.hbm [shape: f32[256,128], index: 3, kind: input, shape index: {}]   ;;  %s3162_s4 = inlined_call_operand.hbm [shape: f32[6,256], index: 4, kind: input, shape index: {}]   ;;  %s3163_s5 = inlined_call_operand.hbm [shape: f32[8,128], index: 5, kind: output, shape index: {}]  }
   0x1   :  { %11 = vsyncpa [#allocation6], 0 }
   0x2   :  { %12 = vsyncpa [#allocation9], 0 }
   0x3   :  { %13 = vsyncpa [#allocation4], 0  ;;  %s2589_s18 = smov [#allocation5]   ;;  %s2449_s22 = scalar_lea.hbm %s3159_s1, 4096 }
   0x4   :  { %s29_s19 = sshll.u32 %s2589_s18, 4  ;;  %p2450_p0 = scmp.ne.s32.totalorder %s3159_s1, %s2449_s22  ;;  %s30_s19 = int_to_ptr.vmem [resolvable:$true] %s29_s19 }
   0x5   :  { %p2453_p1 = scmp.lt.u32.totalorder %s2449_s22, %s3159_s1 }
   0x7   :  { %p2455_p2 = pnand %p2453_p1, %p2450_p0 }
   0x9   :  { %2458 = shalt.err (!%p2455_p2)
}
   0xa   :  { %s2459_s27 = scalar_lea.vmem %s30_s19, 4096  ;;  %p2464_p4 = scmp.lt.s32.totalorder %s30_s19, %s30_s19 }
   0xb   :  { %p2460_p3 = scmp.ne.s32.totalorder %s30_s19, %s2459_s27  ;;  %p2465_p5 = scmp.lt.s32.totalorder %s2459_s27, %s2459_s27 }
   0xd   :  { %p2466_p6 = por %p2465_p5, %p2464_p4 }
   0xf   :  { %p2467_p7 = pnand %p2466_p6, %p2460_p3 }
  0x11   :  { %2470 = shalt.err (!%p2467_p7)
}
  0x12   :  { %s2590_s28 = smov 256   ;;  %s2591_s29 = smov 16  }
  0x13   :  { %35 = dma.hbm_to_vmem [thread:$0]  %s3159_s1, 4096, %s30_s19, [#allocation6], %s2590_s28, %s2590_s28, %s2591_s29  }
  0x14   :  { %s2592_s7 = smov [#allocation8]   ;;  %s2471_s11 = scalar_lea.hbm %s3161_s3, 4096 }
  0x15   :  { %s53_s8 = sshll.u32 %s2592_s7, 4  ;;  %p2472_p8 = scmp.ne.s32.totalorder %s3161_s3, %s2471_s11  ;;  %s54_s8 = int_to_ptr.vmem [resolvable:$true] %s53_s8 }
  0x16   :  { %p2475_p9 = scmp.lt.u32.totalorder %s2471_s11, %s3161_s3 }
  0x18   :  { %p2477_p10 = pnand %p2475_p9, %p2472_p8 }
  0x1a   :  { %2480 = shalt.err (!%p2477_p10)
}
  0x1b   :  { %s2481_s16 = scalar_lea.vmem %s54_s8, 4096  ;;  %p2486_p12 = scmp.lt.s32.totalorder %s54_s8, %s54_s8 }
  0x1c   :  { %p2482_p11 = scmp.ne.s32.totalorder %s54_s8, %s2481_s16  ;;  %p2487_p13 = scmp.lt.s32.totalorder %s2481_s16, %s2481_s16 }
  0x1e   :  { %p2488_p0 = por %p2487_p13, %p2486_p12 }
  0x20   :  { %p2489_p1 = pnand %p2488_p0, %p2482_p11 }
  0x22   :  { %2492 = shalt.err (!%p2489_p1)
}
  0x23   :  { %s2593_s1 = smov 128   ;;  %s2594_s17 = smov 8  }
  0x24   :  { %59 = dma.hbm_to_vmem [thread:$0]  %s3161_s3, 4096, %s54_s8, [#allocation9], %s2593_s1, %s2593_s1, %s2594_s17  }
  0x25   :  { %s2595_s20 = smov [#allocation2]   ;;  %s2596_s22 = smov [#allocation7]  }
  0x26   :  { %s20_s21 = sshll.u32 %s2595_s20, 4  ;;  %s41_s23 = sshll.u32 %s2596_s22, 4  ;;  %s21_s21 = int_to_ptr.vmem [resolvable:$true] %s20_s21  ;;  %s2663_s23 = int_to_ptr.vmem [resolvable:$true] %s41_s23 }
  0x27   :  { %s2493_s26 = scalar_lea.hbm %s3158_s0, 128 }
  0x28   :  { %p2494_p2 = scmp.ne.s32.totalorder %s3158_s0, %s2493_s26  ;;  %p2497_p3 = scmp.lt.u32.totalorder %s2493_s26, %s3158_s0 }
  0x2a   :  { %p2499_p4 = pnand %p2497_p3, %p2494_p2 }
  0x2c   :  { %2502 = shalt.err (!%p2499_p4)
}
  0x2d   :  { %s2503_s3 = scalar_lea.vmem %s21_s21, 128  ;;  %p2508_p6 = scmp.lt.s32.totalorder %s21_s21, %s21_s21 }
  0x2e   :  { %p2504_p5 = scmp.ne.s32.totalorder %s21_s21, %s2503_s3  ;;  %p2509_p7 = scmp.lt.s32.totalorder %s2503_s3, %s2503_s3 }
  0x30   :  { %p2510_p8 = por %p2509_p7, %p2508_p6 }
  0x32   :  { %p2511_p9 = pnand %p2510_p8, %p2504_p5 }
  0x34   :  { %2514 = shalt.err (!%p2511_p9)
}
  0x35   :  { %23 = dma.hbm_to_vmem [thread:$0]  %s3158_s0, 128, %s21_s21, [#allocation3]  }
  0x36   :  { %s2515_s12 = scalar_lea.hbm %s3160_s2, 32768 }
  0x37   :  { %p2516_p10 = scmp.ne.s32.totalorder %s3160_s2, %s2515_s12  ;;  %p2519_p11 = scmp.lt.u32.totalorder %s2515_s12, %s3160_s2 }
  0x39   :  { %p2521_p12 = pnand %p2519_p11, %p2516_p10 }
  0x3b   :  { %2524 = shalt.err (!%p2521_p12)
}
  0x3c   :  { %s2525_s1 = scalar_lea.vmem %s2663_s23, 32768  ;;  %p2530_p0 = scmp.lt.s32.totalorder %s2663_s23, %s2663_s23 }
  0x3d   :  { %p2526_p13 = scmp.ne.s32.totalorder %s2663_s23, %s2525_s1  ;;  %p2531_p1 = scmp.lt.s32.totalorder %s2525_s1, %s2525_s1 }
  0x3f   :  { %p2532_p2 = por %p2531_p1, %p2530_p0 }
  0x41   :  { %p2533_p3 = pnand %p2532_p2, %p2526_p13 }
  0x43   :  { %2536 = shalt.err (!%p2533_p3)
}
  0x44   :  { %47 = dma.hbm_to_vmem [thread:$0]  %s3160_s2, 32768, %s2663_s23, [#allocation6], %s2590_s28, %s2590_s28, %s2591_s29  }
  0x45   :  { %s2597_s18 = smov [#allocation10]   ;;  %s2537_s22 = scalar_lea.hbm %s3162_s4, 256 }
  0x46   :  { %s66_s19 = sshll.u32 %s2597_s18, 4  ;;  %p2538_p4 = scmp.ne.s32.totalorder %s3162_s4, %s2537_s22  ;;  %s67_s19 = int_to_ptr.vmem [resolvable:$true] %s66_s19 }
  0x47   :  { %p2541_p5 = scmp.lt.u32.totalorder %s2537_s22, %s3162_s4 }
  0x49   :  { %p2543_p6 = pnand %p2541_p5, %p2538_p4 }
  0x4b   :  { %2546 = shalt.err (!%p2543_p6)
}
  0x4c   :  { %s2547_s30 = scalar_lea.vmem %s67_s19, 256  ;;  %p2552_p8 = scmp.lt.s32.totalorder %s67_s19, %s67_s19 }
  0x4d   :  { %p2548_p7 = scmp.ne.s32.totalorder %s67_s19, %s2547_s30  ;;  %p2553_p9 = scmp.lt.s32.totalorder %s2547_s30, %s2547_s30 }
  0x4f   :  { %p2554_p10 = por %p2553_p9, %p2552_p8 }
  0x51   :  { %p2555_p11 = pnand %p2554_p10, %p2548_p7 }
  0x53   :  { %2558 = shalt.err (!%p2555_p11)
}
  0x54   :  { %69 = dma.hbm_to_vmem [thread:$0]  %s3162_s4, 256, %s67_s19, [#allocation9]  }
  0x55   :  { %2581 = dma.done.wait [#allocation3], 128  }
  0x56   :  { %2582 = vsyncadd [#allocation3], 4294967168 }
  0x57   :  { %2583 = dma.done.wait [#allocation6], 36864  }
  0x58   :  { %2584 = vsyncadd [#allocation6], 4294930432 }
  0x59   :  { %2585 = dma.done.wait [#allocation9], 4352  }
  0x5a   :  { %2586 = vsyncadd [#allocation9], 4294962944  ;;  %v2598_v0 = vmov 0.0   ;;  %v87_v1 = vld [vmem:[#allocation5 + $0x8] sm:$0xff]  ;;  %v89_v2 = vld [vmem:[#allocation5 + $0x18] sm:$0xff]  ;;  %s2605_s4 = smov [#allocation11]  }
  0x5b   :  { %194 = vmatprep.mubr.f32.mxu0 %v2598_v0  ;;  %v86_v3 = vld [vmem:[#allocation5] sm:$0xff]  ;;  %v2032_v4 = vpack.c.bf16 %v89_v2, %v87_v1  ;;  %v88_v5 = vld [vmem:[#allocation5 + $0x10] sm:$0xff]  ;;  %v91_v6 = vld [vmem:[#allocation5 + $0x28] sm:$0xff]  ;;  %s1946_s29 = sshll.u32 %s2605_s4, 4  ;;  %s1947_s29 = int_to_ptr.vmem [resolvable:$true] %s1946_s29 }
  0x5c   :  { %v93_v7 = vld [vmem:[#allocation5 + $0x38] sm:$0xff]  ;;  %v2034_v8 = vpack.c.bf16 %v88_v5, %v86_v3  ;;  %v90_v10 = vld [vmem:[#allocation5 + $0x20] sm:$0xff]  ;;  %v92_v11 = vld [vmem:[#allocation5 + $0x30] sm:$0xff]  ;;  %s2559_s23 = scalar_lea.vmem %s1947_s29, 128  ;;  %p2564_p13 = scmp.lt.s32.totalorder %s1947_s29, %s1947_s29 }
  0x5d   :  { %v2036_v9 = vpack.c.bf16 %v93_v7, %v91_v6  ;;  %v95_v12 = vld [vmem:[#allocation5 + $0x48] sm:$0xff]  ;;  %2033 = vmatprep.subr.bf16.mxu0 %v2032_v4  ;;  %v97_v13 = vld [vmem:[#allocation5 + $0x58] sm:$0xff]  ;;  %v2038_v14 = vpack.c.bf16 %v92_v11, %v90_v10  ;;  %v94_v16 = vld [vmem:[#allocation5 + $0x40] sm:$0xff]  ;;  %p2560_p12 = scmp.ne.s32.totalorder %s1947_s29, %s2559_s23  ;;  %p2565_p0 = scmp.lt.s32.totalorder %s2559_s23, %s2559_s23 }
  0x5e   :  { %2035 = vmatpush1.bf16.msra.mxu0 %v2034_v8  ;;  %v2040_v15 = vpack.c.bf16 %v97_v13, %v95_v12  ;;  %v96_v17 = vld [vmem:[#allocation5 + $0x50] sm:$0xff]  ;;  %v99_v18 = vld [vmem:[#allocation5 + $0x68] sm:$0xff]  ;;  %v101_v19 = vld [vmem:[#allocation5 + $0x78] sm:$0xff] }
  0x5f   :  { %2037 = vmatprep.subr.bf16.mxu0 %v2036_v9  ;;  %v2042_v20 = vpack.c.bf16 %v96_v17, %v94_v16  ;;  %v2044_v21 = vpack.c.bf16 %v101_v19, %v99_v18  ;;  %v98_v22 = vld [vmem:[#allocation5 + $0x60] sm:$0xff]  ;;  %v100_v23 = vld [vmem:[#allocation5 + $0x70] sm:$0xff]  ;;  %v103_v24 = vld [vmem:[#allocation5 + $0x88] sm:$0xff]  ;;  %p2566_p1 = por %p2565_p0, %p2564_p13 }
  0x60   :  { %v105_v25 = vld [vmem:[#allocation5 + $0x98] sm:$0xff]  ;;  %v2046_v26 = vpack.c.bf16 %v100_v23, %v98_v22  ;;  %v102_v28 = vld [vmem:[#allocation5 + $0x80] sm:$0xff]  ;;  %v104_v29 = vld [vmem:[#allocation5 + $0x90] sm:$0xff] }
  0x61   :  { %v2048_v27 = vpack.c.bf16 %v105_v25, %v103_v24  ;;  %v107_v30 = vld [vmem:[#allocation5 + $0xa8] sm:$0xff]  ;;  %v109_v31 = vld [vmem:[#allocation5 + $0xb8] sm:$0xff]  ;;  %v2050_v32 = vpack.c.bf16 %v104_v29, %v102_v28  ;;  %v106_v34 = vld [vmem:[#allocation5 + $0xa0] sm:$0xff]  ;;  %p2567_p2 = pnand %p2566_p1, %p2560_p12 }
  0x62   :  { %2039 = vmatpush1.bf16.msra.mxu0 %v2038_v14  ;;  %v2052_v33 = vpack.c.bf16 %v109_v31, %v107_v30  ;;  %v108_v35 = vld [vmem:[#allocation5 + $0xb0] sm:$0xff]  ;;  %v111_v36 = vld [vmem:[#allocation5 + $0xc8] sm:$0xff]  ;;  %v113_v37 = vld [vmem:[#allocation5 + $0xd8] sm:$0xff] }
  0x63   :  { %2041 = vmatprep.subr.bf16.mxu0 %v2040_v15  ;;  %v2054_v38 = vpack.c.bf16 %v108_v35, %v106_v34  ;;  %v2056_v39 = vpack.c.bf16 %v113_v37, %v111_v36  ;;  %v110_v40 = vld [vmem:[#allocation5 + $0xc0] sm:$0xff]  ;;  %v112_v41 = vld [vmem:[#allocation5 + $0xd0] sm:$0xff]  ;;  %v115_v42 = vld [vmem:[#allocation5 + $0xe8] sm:$0xff] }
  0x64   :  { %v117_v43 = vld [vmem:[#allocation5 + $0xf8] sm:$0xff]  ;;  %v2058_v44 = vpack.c.bf16 %v112_v41, %v110_v40  ;;  %v114_v46 = vld [vmem:[#allocation5 + $0xe0] sm:$0xff]  ;;  %v116_v47 = vld [vmem:[#allocation5 + $0xf0] sm:$0xff] }
  0x65   :  { %v2060_v45 = vpack.c.bf16 %v117_v43, %v115_v42  ;;  %v2062_v48 = vpack.c.bf16 %v116_v47, %v114_v46  ;;  %v85_v49 = vld [vmem:[#allocation2] sm:$0xff]  ;;  %v410_v50 = vld [vmem:[#allocation7 + $0x8] sm:$0xff]  ;;  %v409_v53 = vld [vmem:[#allocation7] sm:$0xff] }
  0x66   :  { %2043 = vmatpush1.bf16.msra.mxu0 %v2042_v20  ;;  %v412_v51 = vld [vmem:[#allocation7 + $0x18] sm:$0xff]  ;;  %v411_v54 = vld [vmem:[#allocation7 + $0x10] sm:$0xff]  ;;  %v414_v56 = vld [vmem:[#allocation7 + $0x28] sm:$0xff] }
  0x67   :  { %2045 = vmatprep.subr.bf16.mxu0 %v2044_v21  ;;  %v2064_v52 = vpack.c.bf16 %v412_v51, %v410_v50  ;;  %v2066_v55 = vpack.c.bf16 %v411_v54, %v409_v53  ;;  %v416_v57 = vld [vmem:[#allocation7 + $0x38] sm:$0xff]  ;;  %v413_v59 = vld [vmem:[#allocation7 + $0x20] sm:$0xff]  ;;  %v415_v60 = vld [vmem:[#allocation7 + $0x30] sm:$0xff] }
  0x68   :  { %v2068_v58 = vpack.c.bf16 %v416_v57, %v414_v56  ;;  %v2070_v61 = vpack.c.bf16 %v415_v60, %v413_v59  ;;  %v418_v62 = vld [vmem:[#allocation7 + $0x48] sm:$0xff]  ;;  %v420_v63 = vld [vmem:[#allocation7 + $0x58] sm:$0xff]  ;;  %v417_v1 = vld [vmem:[#allocation7 + $0x40] sm:$0xff] }
  0x69   :  { %2065 = vmatprep.subr.bf16.mxu1 %v2064_v52  ;;  %v2072_v0 = vpack.c.bf16 %v420_v63, %v418_v62  ;;  %v419_v2 = vld [vmem:[#allocation7 + $0x50] sm:$0xff]  ;;  %v422_v4 = vld [vmem:[#allocation7 + $0x68] sm:$0xff]  ;;  %v424_v5 = vld [vmem:[#allocation7 + $0x78] sm:$0xff] }
  0x6a   :  { %2047 = vmatpush1.bf16.msra.mxu0 %v2046_v26  ;;  %2067 = vmatpush1.bf16.msra.mxu1 %v2066_v55  ;;  %v2074_v3 = vpack.c.bf16 %v419_v2, %v417_v1  ;;  %v2076_v6 = vpack.c.bf16 %v424_v5, %v422_v4  ;;  %v421_v7 = vld [vmem:[#allocation7 + $0x60] sm:$0xff]  ;;  %v423_v8 = vld [vmem:[#allocation7 + $0x70] sm:$0xff]  ;;  %v426_v10 = vld [vmem:[#allocation7 + $0x88] sm:$0xff] }
  0x6b   :  { %2049 = vmatprep.subr.bf16.mxu0 %v2048_v27  ;;  %2069 = vmatprep.subr.bf16.mxu1 %v2068_v58  ;;  %v2078_v9 = vpack.c.bf16 %v423_v8, %v421_v7  ;;  %v428_v11 = vld [vmem:[#allocation7 + $0x98] sm:$0xff]  ;;  %v425_v13 = vld [vmem:[#allocation7 + $0x80] sm:$0xff]  ;;  %v427_v14 = vld [vmem:[#allocation7 + $0x90] sm:$0xff] }
  0x6c   :  { %v2080_v12 = vpack.c.bf16 %v428_v11, %v426_v10  ;;  %v2082_v15 = vpack.c.bf16 %v427_v14, %v425_v13  ;;  %v430_v16 = vld [vmem:[#allocation7 + $0xa8] sm:$0xff]  ;;  %v432_v17 = vld [vmem:[#allocation7 + $0xb8] sm:$0xff]  ;;  %v429_v19 = vld [vmem:[#allocation7 + $0xa0] sm:$0xff] }
  0x6d   :  { %v2084_v18 = vpack.c.bf16 %v432_v17, %v430_v16  ;;  %v431_v20 = vld [vmem:[#allocation7 + $0xb0] sm:$0xff]  ;;  %v434_v22 = vld [vmem:[#allocation7 + $0xc8] sm:$0xff]  ;;  %v436_v23 = vld [vmem:[#allocation7 + $0xd8] sm:$0xff] }
  0x6e   :  { %2051 = vmatpush1.bf16.msra.mxu0 %v2050_v32  ;;  %2071 = vmatpush1.bf16.msra.mxu1 %v2070_v61  ;;  %v2086_v21 = vpack.c.bf16 %v431_v20, %v429_v19  ;;  %v2088_v24 = vpack.c.bf16 %v436_v23, %v434_v22  ;;  %v433_v25 = vld [vmem:[#allocation7 + $0xc0] sm:$0xff]  ;;  %v435_v26 = vld [vmem:[#allocation7 + $0xd0] sm:$0xff]  ;;  %v438_v28 = vld [vmem:[#allocation7 + $0xe8] sm:$0xff] }
  0x6f   :  { %2053 = vmatprep.subr.bf16.mxu0 %v2052_v33  ;;  %2073 = vmatprep.subr.bf16.mxu1 %v2072_v0  ;;  %v2090_v27 = vpack.c.bf16 %v435_v26, %v433_v25  ;;  %v440_v29 = vld [vmem:[#allocation7 + $0xf8] sm:$0xff]  ;;  %v437_v31 = vld [vmem:[#allocation7 + $0xe0] sm:$0xff]  ;;  %v439_v32 = vld [vmem:[#allocation7 + $0xf0] sm:$0xff] }
  0x70   :  { %v2092_v30 = vpack.c.bf16 %v440_v29, %v438_v28  ;;  %v2094_v33 = vpack.c.bf16 %v439_v32, %v437_v31  ;;  %v442_v34 = vld [vmem:[#allocation7 + $0x108] sm:$0xff]  ;;  %v444_v35 = vld [vmem:[#allocation7 + $0x118] sm:$0xff]  ;;  %v441_v37 = vld [vmem:[#allocation7 + $0x100] sm:$0xff] }
  0x71   :  { %v2096_v36 = vpack.c.bf16 %v444_v35, %v442_v34  ;;  %v446_v40 = vld [vmem:[#allocation7 + $0x128] sm:$0xff]  ;;  %v448_v41 = vld [vmem:[#allocation7 + $0x138] sm:$0xff]  ;;  %v445_v43 = vld [vmem:[#allocation7 + $0x120] sm:$0xff] }
  0x72   :  { %2055 = vmatpush1.bf16.msra.mxu0 %v2054_v38  ;;  %2075 = vmatpush1.bf16.msra.mxu1 %v2074_v3  ;;  %v443_v38 = vld [vmem:[#allocation7 + $0x110] sm:$0xff]  ;;  %v2100_v42 = vpack.c.bf16 %v448_v41, %v446_v40  ;;  %v450_v46 = vld [vmem:[#allocation7 + $0x148] sm:$0xff]  ;;  %v452_v47 = vld [vmem:[#allocation7 + $0x158] sm:$0xff] }
  0x73   :  { %2057 = vmatprep.subr.bf16.mxu0 %v2056_v39  ;;  %2077 = vmatprep.subr.bf16.mxu1 %v2076_v6  ;;  %v2098_v39 = vpack.c.bf16 %v443_v38, %v441_v37  ;;  %v451_v50 = vld [vmem:[#allocation7 + $0x150] sm:$0xff]  ;;  %v454_v51 = vld [vmem:[#allocation7 + $0x168] sm:$0xff]  ;;  %v456_v52 = vld [vmem:[#allocation7 + $0x178] sm:$0xff] }
  0x74   :  { %v2108_v54 = vpack.c.bf16 %v456_v52, %v454_v51  ;;  %v453_v55 = vld [vmem:[#allocation7 + $0x160] sm:$0xff]  ;;  %v455_v56 = vld [vmem:[#allocation7 + $0x170] sm:$0xff]  ;;  %v458_v57 = vld [vmem:[#allocation7 + $0x188] sm:$0xff]  ;;  %v2600_v51 = vmov 2475754826  }
  0x75   :  { %v460_v58 = vld [vmem:[#allocation7 + $0x198] sm:$0xff]  ;;  %v2110_v59 = vpack.c.bf16 %v455_v56, %v453_v55  ;;  %v457_v61 = vld [vmem:[#allocation7 + $0x180] sm:$0xff]  ;;  %v459_v62 = vld [vmem:[#allocation7 + $0x190] sm:$0xff]  ;;  %v2602_v56 = vmov 2102212464  }
  0x76   :  { %2059 = vmatpush1.bf16.msra.mxu0 %v2058_v44  ;;  %2079 = vmatpush1.bf16.msra.mxu1 %v2078_v9  ;;  %v447_v44 = vld [vmem:[#allocation7 + $0x130] sm:$0xff]  ;;  %v2112_v60 = vpack.c.bf16 %v460_v58, %v458_v57  ;;  %v462_v63 = vld [vmem:[#allocation7 + $0x1a8] sm:$0xff]  ;;  %v464_v0 = vld [vmem:[#allocation7 + $0x1b8] sm:$0xff]  ;;  %v2114_v1 = vpack.c.bf16 %v459_v62, %v457_v61  ;;  %v2603_v58 = vmov 920167782  }
  0x77   :  { %2061 = vmatprep.subr.bf16.mxu0 %v2060_v45  ;;  %2081 = vmatprep.subr.bf16.mxu1 %v2080_v12  ;;  %v2102_v45 = vpack.c.bf16 %v447_v44, %v445_v43  ;;  %v2116_v2 = vpack.c.bf16 %v464_v0, %v462_v63  ;;  %v461_v3 = vld [vmem:[#allocation7 + $0x1a0] sm:$0xff]  ;;  %v463_v4 = vld [vmem:[#allocation7 + $0x1b0] sm:$0xff]  ;;  %v466_v5 = vld [vmem:[#allocation7 + $0x1c8] sm:$0xff] }
  0x78   :  { %v468_v6 = vld [vmem:[#allocation7 + $0x1d8] sm:$0xff]  ;;  %v2118_v7 = vpack.c.bf16 %v463_v4, %v461_v3  ;;  %v465_v9 = vld [vmem:[#allocation7 + $0x1c0] sm:$0xff]  ;;  %v467_v10 = vld [vmem:[#allocation7 + $0x1d0] sm:$0xff] }
  0x79   :  { %v2120_v8 = vpack.c.bf16 %v468_v6, %v466_v5  ;;  %v470_v11 = vld [vmem:[#allocation7 + $0x1e8] sm:$0xff]  ;;  %v472_v12 = vld [vmem:[#allocation7 + $0x1f8] sm:$0xff]  ;;  %v2122_v13 = vpack.c.bf16 %v467_v10, %v465_v9  ;;  %v471_v16 = vld [vmem:[#allocation7 + $0x1f0] sm:$0xff] }
  0x7a   :  { %2063 = vmatpush1.bf16.msra.mxu0 %v2062_v48  ;;  %2083 = vmatpush1.bf16.msra.mxu1 %v2082_v15  ;;  %v449_v48 = vld [vmem:[#allocation7 + $0x140] sm:$0xff]  ;;  %v2124_v14 = vpack.c.bf16 %v472_v12, %v470_v11 }
  0x7b   :  { %2085 = vmatprep.subr.bf16.mxu1 %v2084_v18  ;;  %v2106_v53 = vpack.c.bf16 %v451_v50, %v449_v48  ;;  %v469_v15 = vld [vmem:[#allocation7 + $0x1e0] sm:$0xff]  ;;  %v120_v18 = vlaneseq }
  0x7c   :  { %v2126_v17 = vpack.c.bf16 %v471_v16, %v469_v15 }
  0x7d   :  { %195 = vmatmul.mubr.f32.vlgmr.msra.gmra.mrb[0].mxu0 %v85_v49  ;;  %v2104_v49 = vpack.c.bf16 %v452_v47, %v450_v46  ;;  %v121_v19 = vshrl.u32 %v120_v18, 7 }
  0x7e   :  { %2087 = vmatpush1.bf16.msra.mxu1 %v2086_v21  ;;  %v118_v21 = vld [vmem:[#allocation10] ss:$8 sm:$0x3] }
  0x7f   :  { %2089 = vmatprep.subr.bf16.mxu1 %v2088_v24  ;;  %v2709_v20 = vsub.s32 0, %v121_v19  ;;  %v2711_v22 = vsub.s32 1, %v121_v19 }
  0x81   :  { %v123_v23 = vrot.slane %v118_v21, %v2709_v20  ;;  %v127_v24 = vrot.slane %v118_v21, %v2711_v22 }
  0x82   :  { %2091 = vmatpush1.bf16.msra.mxu1 %v2090_v27 }
  0x83   :  { %2093 = vmatprep.subr.bf16.mxu1 %v2092_v30 }
  0x86   :  { %2095 = vmatpush1.bf16.msra.mxu1 %v2094_v33 }
  0x87   :  { %2097 = vmatprep.subr.bf16.mxu1 %v2096_v36 }
  0x8a   :  { %2099 = vmatpush1.bf16.msra.mxu1 %v2098_v39 }
  0x8b   :  { %2101 = vmatprep.subr.bf16.mxu1 %v2100_v42 }
  0x8e   :  { %2103 = vmatpush1.bf16.msra.mxu1 %v2102_v45 }
  0x8f   :  { %2105 = vmatprep.subr.bf16.mxu1 %v2104_v49  ;;  %v2599_v49 = vmov 683565275  }
  0x92   :  { %2107 = vmatpush1.bf16.msra.mxu1 %v2106_v53 }
  0x93   :  { %2109 = vmatprep.subr.bf16.mxu1 %v2108_v54  ;;  %v2601_v54 = vmov 2131351028  }
  0x96   :  { %2111 = vmatpush1.bf16.msra.mxu1 %v2110_v59 }
  0x97   :  { %2113 = vmatprep.subr.bf16.mxu1 %v2112_v60 }
  0x9a   :  { %2115 = vmatpush1.bf16.msra.mxu1 %v2114_v1  ;;  %v2604_v1 = vmov 1326507024  }
  0x9b   :  { %2117 = vmatprep.subr.bf16.mxu1 %v2116_v2 }
  0x9e   :  { %2119 = vmatpush1.bf16.msra.mxu1 %v2118_v7 }
  0x9f   :  { %2121 = vmatprep.subr.bf16.mxu1 %v2120_v8 }
  0xa2   :  { %2123 = vmatpush1.bf16.msra.mxu1 %v2122_v13 }
  0xa3   :  { %2125 = vmatprep.subr.bf16.mxu1 %v2124_v14 }
  0xa6   :  { %2127 = vmatpush1.bf16.msra.mxu1 %v2126_v17 }
 0x150   :  { %v196_v25 = vpop.f32.mrb[0].mxu0 }
 0x151   :  { %v2715_v26 = vadd.f32 %v196_v25, %v123_v23  ;;  %v198_v27 = vpop.f32.mrb[1].mxu0 }
 0x152   :  { %v2717_v28 = vadd.f32 %v198_v27, %v127_v24 }
 0x153   :  { %v201_v29 = vand.u32 2147483647, %v2715_v26  ;;  %v204_v30 = vand.u32 2139095040, %v2715_v26  ;;  %vm203_vm14 = vcmp.lt.s32.totalorder %v2715_v26, 0 }
 0x154   :  { %v308_v31 = vand.u32 2139095040, %v2717_v28  ;;  %v305_v40 = vand.u32 2147483647, %v2717_v28 }
 0x155   :  { %v205_v32 = vshrl.u32 %v204_v30, 23  ;;  %v208_v33 = vand.u32 8388607, %v201_v29  ;;  %vm202_vm15 = vcmp.le.f32.partialorder %v201_v29, 0.7853982 }
 0x156   :  { %v309_v34 = vshrl.u32 %v308_v31, 23  ;;  %v2731_v47 = vand.u32 8388607, %v305_v40 }
 0x157   :  { %v1957_v35 = vadd.s32 4294967169, %v205_v32  ;;  %v209_v38 = vor.u32 8388608, %v208_v33 }
 0x158   :  { %v1961_v36 = vadd.s32 4294967169, %v309_v34 }
 0x159   :  { %v211_v37 = vadd.s32 1, %v1957_v35  ;;  %v2725_v45 = vshll.u32 %v209_v38, 8 }
 0x15a   :  { %v315_v39 = vadd.s32 1, %v1961_v36 }
 0x15b   :  { %vm212_vm0 = vcmp.gt.s32.totalorder %v211_v37, 0 }
 0x15c   :  { %v213_v41 = vsel %vm212_vm0, %v211_v37, 0  ;;  %vm316_vm1 = vcmp.gt.s32.totalorder %v315_v39, 0  ;;  %v313_v37 = vor.u32 8388608, %v2731_v47  ;;  %vm307_vm0 = vcmp.lt.s32.totalorder %v2717_v28, 0 }
 0x15d   :  { %v214_v42 = vshrl.u32 %v213_v41, 5  ;;  %v215_v43 = vand.u32 31, %v213_v41  ;;  %v317_v44 = vsel %vm316_vm1, %v315_v39, 0  ;;  %vm306_vm1 = vcmp.le.f32.partialorder %v305_v40, 0.7853982 }
 0x15e   :  { %v2727_v46 = vshrl.u32 %v317_v44, 5  ;;  %v319_v53 = vand.u32 31, %v317_v44 }
 0x15f   :  { %v216_v48 = vsub.s32 32, %v215_v43  ;;  %v218_v50 = vshll.u32 %v2599_v49, %v215_v43  ;;  %v221_v52 = vshll.u32 %v2600_v51, %v215_v43  ;;  %v224_v55 = vshll.u32 %v2601_v54, %v215_v43 }
 0x160   :  { %v227_v57 = vshll.u32 %v2602_v56, %v215_v43  ;;  %v230_v59 = vshll.u32 %v2603_v58, %v215_v43  ;;  %vm233_vm2 = vcmp.lt.s32.totalorder %v214_v42, 1  ;;  %vm234_vm3 = vcmp.lt.s32.totalorder %v214_v42, 2 }
 0x161   :  { %v219_v60 = vshrl.u32 %v2600_v51, %v216_v48  ;;  %v222_v61 = vshrl.u32 %v2601_v54, %v216_v48  ;;  %v225_v62 = vshrl.u32 %v2602_v56, %v216_v48  ;;  %v217_v63 = vshrl.u32 %v2599_v49, %v216_v48 }
 0x162   :  { %v228_v0 = vshrl.u32 %v2603_v58, %v216_v48  ;;  %v231_v2 = vshrl.u32 %v2604_v1, %v216_v48  ;;  %vm235_vm4 = vcmp.lt.s32.totalorder %v214_v42, 3  ;;  %v320_v6 = vsub.s32 32, %v319_v53 }
 0x163   :  { %v220_v3 = vor.u32 %v219_v60, %v218_v50  ;;  %v223_v4 = vor.u32 %v222_v61, %v221_v52  ;;  %v226_v5 = vor.u32 %v225_v62, %v224_v55  ;;  %vm236_vm5 = vcmp.lt.s32.totalorder %v214_v42, 4 }
 0x164   :  { %v229_v7 = vor.u32 %v228_v0, %v227_v57  ;;  %v232_v8 = vor.u32 %v231_v2, %v230_v59  ;;  %v331_v9 = vshll.u32 %v2602_v56, %v319_v53  ;;  %v332_v17 = vshrl.u32 %v2603_v58, %v320_v6 }
 0x165   :  { %v237_v10 = vsel %vm233_vm2, %v217_v63, %v220_v3  ;;  %v238_v11 = vsel %vm236_vm5, %v226_v5, 2102212464  ;;  %v241_v12 = vsel %vm233_vm2, %v220_v3, %v223_v4  ;;  %v245_v13 = vsel %vm233_vm2, %v223_v4, %v226_v5 }
 0x166   :  { %v239_v14 = vsel %vm235_vm4, %v223_v4, %v238_v11  ;;  %v242_v15 = vsel %vm236_vm5, %v229_v7, 920167782  ;;  %v246_v16 = vsel %vm236_vm5, %v232_v8, 1326507024  ;;  %v335_v23 = vshrl.u32 %v2604_v1, %v320_v6 }
 0x167   :  { %v240_v18 = vsel %vm234_vm3, %v237_v10, %v239_v14  ;;  %v243_v19 = vsel %vm235_vm4, %v226_v5, %v242_v15  ;;  %v247_v21 = vsel %vm235_vm4, %v229_v7, %v246_v16  ;;  %v333_v27 = vor.u32 %v332_v17, %v331_v9 }
 0x168   :  { %v244_v24 = vsel %vm234_vm3, %v241_v12, %v243_v19  ;;  %v248_v25 = vsel %vm234_vm3, %v245_v13, %v247_v21  ;;  %v334_v30 = vshll.u32 %v2603_v58, %v319_v53  ;;  %v256_v35 = vmul.u32 %v2725_v45, %v240_v18 }
 0x169   :  { %v2758_v31 = vmul.u32.u64.low %v2725_v45, %v248_v25  ;;  %v2759_v32 = vmul.u32.u64.high %v2725_v45, %v248_v25, %v2758_v31  ;;  %v2762_v33 = vmul.u32.u64.low %v2725_v45, %v244_v24  ;;  %v2763_v34 = vmul.u32.u64.high %v2725_v45, %v244_v24, %v2762_v33 }
 0x16a   :  { %v336_v36 = vor.u32 %v335_v23, %v334_v30  ;;  %vm340_vm6 = vcmp.lt.s32.totalorder %v2727_v46, 4  ;;  %v322_v38 = vshll.u32 %v2599_v49, %v319_v53  ;;  %v323_v39 = vshrl.u32 %v2600_v51, %v320_v6 }
 0x16b   :  { %v326_v41 = vshrl.u32 %v2601_v54, %v320_v6  ;;  %v325_v43 = vshll.u32 %v2600_v51, %v319_v53  ;;  %v328_v44 = vshll.u32 %v2601_v54, %v319_v53  ;;  %v329_v45 = vshrl.u32 %v2602_v56, %v320_v6 }
 0x16c   :  { %v350_v42 = vsel %vm340_vm6, %v336_v36, 1326507024  ;;  %vm258_vm7 = vc.u32 %v2759_v32, %v2762_v33  ;;  %v259_v47 = vadd.s32 1, %v2763_v34  ;;  %v346_v48 = vsel %vm340_vm6, %v333_v27, 920167782 }
 0x16d   :  { %v324_v50 = vor.u32 %v323_v39, %v322_v38  ;;  %v321_v52 = vshrl.u32 %v2599_v49, %v320_v6  ;;  %v327_v55 = vor.u32 %v326_v41, %v325_v43  ;;  %v330_v57 = vor.u32 %v329_v45, %v328_v44 }
 0x16e   :  { %vm339_vm8 = vcmp.lt.s32.totalorder %v2727_v46, 3  ;;  %v260_v59 = vsel %vm258_vm7, %v259_v47, %v2763_v34  ;;  %vm337_vm9 = vcmp.lt.s32.totalorder %v2727_v46, 1  ;;  %vm338_vm10 = vcmp.lt.s32.totalorder %v2727_v46, 2 }
 0x16f   :  { %v351_v53 = vsel %vm339_vm8, %v333_v27, %v350_v42  ;;  %v261_v60 = vadd.s32 %v260_v59, %v256_v35  ;;  %v342_v61 = vsel %vm340_vm6, %v330_v57, 2102212464  ;;  %v345_v62 = vsel %vm337_vm9, %v324_v50, %v327_v55 }
 0x170   :  { %v347_v63 = vsel %vm339_vm8, %v330_v57, %v346_v48  ;;  %v349_v2 = vsel %vm337_vm9, %v327_v55, %v330_v57  ;;  %v353_v3 = vshll.u32 %v313_v37, 8  ;;  %v341_v5 = vsel %vm337_vm9, %v321_v52, %v324_v50 }
 0x171   :  { %v348_v0 = vsel %vm338_vm10, %v345_v62, %v347_v63  ;;  %v262_v4 = vadd.s32 536870912, %v261_v60  ;;  %v343_v6 = vsel %vm339_vm8, %v327_v55, %v342_v61  ;;  %v352_v7 = vsel %vm338_vm10, %v349_v2, %v351_v53 }
 0x172   :  { %v2791_v8 = vmul.u32.u64.low %v353_v3, %v352_v7  ;;  %v2792_v9 = vmul.u32.u64.high %v353_v3, %v352_v7, %v2791_v8  ;;  %v2794_v10 = vmul.u32.u64.low %v353_v3, %v348_v0  ;;  %v2795_v11 = vmul.u32.u64.high %v353_v3, %v348_v0, %v2794_v10 }
 0x173   :  { %v263_v12 = vshrl.u32 %v262_v4, 30  ;;  %v344_v13 = vsel %vm338_vm10, %v341_v5, %v343_v6  ;;  %v257_v35 = vadd.s32 %v2762_v33, %v2759_v32  ;;  %vm293_vm5 = vweird.f32 %v2715_v26 }
 0x174   :  { %vm362_vm11 = vc.u32 %v2792_v9, %v2794_v10  ;;  %v363_v15 = vadd.s32 1, %v2795_v11  ;;  %v360_v17 = vmul.u32 %v353_v3, %v344_v13  ;;  %v361_v32 = vadd.s32 %v2794_v10, %v2792_v9 }
 0x175   :  { %v264_v14 = vshll.u32 %v263_v12, 30  ;;  %v287_v59 = vsub.s32 4, %v263_v12  ;;  %vm397_vm9 = vweird.f32 %v2717_v28 }
 0x176   :  { %v364_v18 = vsel %vm362_vm11, %v363_v15, %v2795_v11 }
 0x177   :  { %v265_v16 = vsub.s32 %v261_v60, %v264_v14  ;;  %v365_v21 = vadd.s32 %v364_v18, %v360_v17  ;;  %v288_v5 = vsel %vm203_vm14, %v287_v59, %v263_v12  ;;  %v772_v59 = vld [vmem:[#allocation7 + $0x230] sm:$0xff] }
 0x178   :  { %v290_v8 = vsel %vm202_vm15, 0, %v288_v5 }
 0x179   :  { %v267_v19 = vsub.s32 0, %v265_v16  ;;  %v366_v24 = vadd.s32 536870912, %v365_v21  ;;  %v294_v14 = vadd.s32 3, %v290_v8 }
 0x17b   :  { %v1958_v23 = vmin.u32 %v267_v19, %v265_v16  ;;  %v367_v27 = vshrl.u32 %v366_v24, 30  ;;  %v295_v12 = vand.u32 3, %v294_v14  ;;  %v789_v14 = vld [vmem:[#allocation7 + $0x2b8] sm:$0xff] }
 0x17d   :  { %v269_v25 = vclz %v1958_v23  ;;  %v368_v31 = vshll.u32 %v367_v27, 30  ;;  %v391_v13 = vsub.s32 4, %v367_v27  ;;  %vm300_vm2 = vcmp.eq.s32.totalorder %v295_v12, 2 }
 0x17e   :  { %vm297_vm3 = vcmp.eq.s32.totalorder %v295_v12, 0  ;;  %vm296_vm4 = vcmp.lt.s32.totalorder %v295_v12, 2 }
 0x17f   :  { %v1959_v30 = vadd.s32 4294967294, %v269_v25  ;;  %v369_v46 = vsub.s32 %v365_v21, %v368_v31 }
 0x181   :  { %vm1960_vm12 = vcmp.lt.s32.totalorder %v1959_v30, 0  ;;  %v371_v38 = vsub.s32 0, %v369_v46 }
 0x182   :  { %v272_v34 = vsel %vm1960_vm12, 0, %v1959_v30 }
 0x183   :  { %v273_v36 = vsub.s32 32, %v272_v34  ;;  %v277_v37 = vsub.s32 4294967266, %v272_v34  ;;  %v274_v39 = vshll.u32 %v265_v16, %v272_v34  ;;  %v1962_v43 = vmin.u32 %v371_v38, %v369_v46 }
 0x184   :  { %v392_v16 = vsel %vm307_vm0, %v391_v13, %v367_v27  ;;  %v787_v13 = vld [vmem:[#allocation7 + $0x2a8] sm:$0xff] }
 0x185   :  { %v275_v41 = vshrl.u32 %v257_v35, %v273_v36  ;;  %v278_v42 = vadd.s32 127, %v277_v37  ;;  %v373_v47 = vclz %v1962_v43  ;;  %v394_v21 = vsel %vm306_vm1, 0, %v392_v16  ;;  %v767_v43 = vld [vmem:[#allocation7 + $0x208] sm:$0xff]  ;;  %v788_v16 = vld [vmem:[#allocation7 + $0x2b0] sm:$0xff] }
 0x186   :  { %v398_v30 = vadd.s32 3, %v394_v21  ;;  %v790_v21 = vld [vmem:[#allocation7 + $0x2c0] sm:$0xff] }
 0x187   :  { %v276_v44 = vor.u32 %v275_v41, %v274_v39  ;;  %v279_v45 = vshll.u32 %v278_v42, 23  ;;  %v1963_v50 = vadd.s32 4294967294, %v373_v47  ;;  %v768_v47 = vld [vmem:[#allocation7 + $0x210] sm:$0xff] }
 0x189   :  { %v280_v48 = vor.u32 4788187, %v279_v45  ;;  %v283_v55 = vcvt.s32.f32 %v276_v44  ;;  %vm1964_vm13 = vcmp.lt.s32.totalorder %v1963_v50, 0  ;;  %v766_v45 = vld [vmem:[#allocation7 + $0x200] sm:$0xff] }
 0x18a   :  { %v376_v57 = vsel %vm1964_vm13, 0, %v1963_v50  ;;  %v771_v50 = vld [vmem:[#allocation7 + $0x228] sm:$0xff] }
 0x18b   :  { %v281_v52 = vand.u32 2147483647, %v280_v48  ;;  %v377_v33 = vsub.s32 32, %v376_v57  ;;  %v381_v60 = vsub.s32 4294967266, %v376_v57  ;;  %v378_v62 = vshll.u32 %v369_v46, %v376_v57  ;;  %v770_v57 = vld [vmem:[#allocation7 + $0x220] sm:$0xff] }
 0x18c   :  { %v399_v46 = vand.u32 3, %v398_v30  ;;  %v2130_v48 = vpack.c.bf16 %v768_v47, %v766_v45  ;;  %v797_v30 = vld [vmem:[#allocation7 + $0x2f8] sm:$0xff]  ;;  %v807_v47 = vld [vmem:[#allocation7 + $0x348] sm:$0xff] }
 0x18d   :  { %v284_v53 = vmul.f32 %v283_v55, %v281_v52  ;;  %v379_v63 = vshrl.u32 %v361_v32, %v377_v33  ;;  %v382_v0 = vadd.s32 127, %v381_v60  ;;  %v773_v52 = vld [vmem:[#allocation7 + $0x238] sm:$0xff]  ;;  %v774_v60 = vld [vmem:[#allocation7 + $0x240] sm:$0xff] }
 0x18e   :  { %vm404_vm6 = vcmp.eq.s32.totalorder %v399_v46, 2  ;;  %vm401_vm7 = vcmp.eq.s32.totalorder %v399_v46, 0  ;;  %vm400_vm8 = vcmp.lt.s32.totalorder %v399_v46, 2  ;;  %v2132_v55 = vpack.c.bf16 %v773_v52, %v771_v50  ;;  %v777_v32 = vld [vmem:[#allocation7 + $0x258] sm:$0xff]  ;;  %v806_v52 = vld [vmem:[#allocation7 + $0x340] sm:$0xff] }
 0x18f   :  { %v285_v61 = vxor.u32 2147483648, %v284_v53  ;;  %v380_v3 = vor.u32 %v379_v63, %v378_v62  ;;  %v383_v4 = vshll.u32 %v382_v0, 23  ;;  %v779_v63 = vld [vmem:[#allocation7 + $0x268] sm:$0xff]  ;;  %v781_v0 = vld [vmem:[#allocation7 + $0x278] sm:$0xff] }
 0x191   :  { %v286_v2 = vsel %vm203_vm14, %v285_v61, %v284_v53  ;;  %v384_v7 = vor.u32 4788187, %v383_v4  ;;  %v387_v10 = vcvt.s32.f32 %v380_v3  ;;  %v2134_v53 = vpack.c.bf16 %v772_v59, %v770_v57  ;;  %v776_v61 = vld [vmem:[#allocation7 + $0x250] sm:$0xff]  ;;  %v778_v3 = vld [vmem:[#allocation7 + $0x260] sm:$0xff]  ;;  %v811_v59 = vld [vmem:[#allocation7 + $0x368] sm:$0xff] }
 0x192   :  { %v289_v6 = vsel %vm202_vm15, %v2715_v26, %v286_v2  ;;  %v769_v26 = vld [vmem:[#allocation7 + $0x218] sm:$0xff]  ;;  %v2138_v62 = vpack.c.bf16 %v776_v61, %v774_v60  ;;  %v2140_v2 = vpack.c.bf16 %v781_v0, %v779_v63  ;;  %v780_v4 = vld [vmem:[#allocation7 + $0x270] sm:$0xff]  ;;  %v815_v60 = vld [vmem:[#allocation7 + $0x388] sm:$0xff] }
 0x193   :  { %2409 = vcosq.f32 %v289_v6  ;;  %v385_v9 = vand.u32 2147483647, %v384_v7  ;;  %v2128_v44 = vpack.c.bf16 %v769_v26, %v767_v43  ;;  %v2142_v5 = vpack.c.bf16 %v780_v4, %v778_v3  ;;  %v785_v7 = vld [vmem:[#allocation7 + $0x298] sm:$0xff]  ;;  %v802_v26 = vld [vmem:[#allocation7 + $0x320] sm:$0xff]  ;;  %v819_v3 = vld [vmem:[#allocation7 + $0x3a8] sm:$0xff] }
 0x194   :  { %2411 = vsinq.f32 %v289_v6  ;;  %v783_v6 = vld [vmem:[#allocation7 + $0x288] sm:$0xff]  ;;  %v817_v61 = vld [vmem:[#allocation7 + $0x398] sm:$0xff]  ;;  %v814_v0 = vld [vmem:[#allocation7 + $0x380] sm:$0xff] }
 0x195   :  { %v388_v11 = vmul.f32 %v387_v10, %v385_v9  ;;  %2129 = vmatprep.subr.bf16.mxu0 %v2128_v44  ;;  %v2144_v8 = vpack.c.bf16 %v785_v7, %v783_v6  ;;  %v782_v9 = vld [vmem:[#allocation7 + $0x280] sm:$0xff]  ;;  %v784_v10 = vld [vmem:[#allocation7 + $0x290] sm:$0xff]  ;;  %v2176_v63 = vpack.c.bf16 %v817_v61, %v815_v60  ;;  %v821_v4 = vld [vmem:[#allocation7 + $0x3b8] sm:$0xff] }
 0x196   :  { %2131 = vmatpush1.bf16.msra.mxu0 %v2130_v48  ;;  %v804_v44 = vld [vmem:[#allocation7 + $0x330] sm:$0xff]  ;;  %v809_v48 = vld [vmem:[#allocation7 + $0x358] sm:$0xff]  ;;  %v2180_v6 = vpack.c.bf16 %v821_v4, %v819_v3  ;;  %v818_v7 = vld [vmem:[#allocation7 + $0x3a0] sm:$0xff] }
 0x197   :  { %v389_v15 = vxor.u32 2147483648, %v388_v11  ;;  %2133 = vmatprep.subr.bf16.mxu0 %v2132_v55  ;;  %v2166_v45 = vpack.c.bf16 %v804_v44, %v802_v26  ;;  %v2168_v50 = vpack.c.bf16 %v809_v48, %v807_v47  ;;  %v808_v55 = vld [vmem:[#allocation7 + $0x350] sm:$0xff] }
 0x198   :  { %v2170_v57 = vpack.c.bf16 %v808_v55, %v806_v52 }
 0x199   :  { %v390_v29 = vsel %vm307_vm0, %v389_v15, %v388_v11  ;;  %v2146_v11 = vpack.c.bf16 %v784_v10, %v782_v9  ;;  %v2148_v15 = vpack.c.bf16 %v789_v14, %v787_v13  ;;  %v823_v9 = vld [vmem:[#allocation7 + $0x3c8] sm:$0xff]  ;;  %v825_v10 = vld [vmem:[#allocation7 + $0x3d8] sm:$0xff]  ;;  %v822_v14 = vld [vmem:[#allocation7 + $0x3c0] sm:$0xff] }
 0x19a   :  { %v393_v17 = vsel %vm306_vm1, %v2717_v28, %v390_v29  ;;  %2135 = vmatpush1.bf16.msra.mxu0 %v2134_v53  ;;  %v775_v28 = vld [vmem:[#allocation7 + $0x248] sm:$0xff]  ;;  %v786_v29 = vld [vmem:[#allocation7 + $0x2a0] sm:$0xff]  ;;  %v813_v53 = vld [vmem:[#allocation7 + $0x378] sm:$0xff]  ;;  %v2184_v13 = vpack.c.bf16 %v825_v10, %v823_v9 }
 0x19b   :  { %2413 = vcosq.f32 %v393_v17  ;;  %v2136_v33 = vpack.c.bf16 %v777_v32, %v775_v28  ;;  %v2150_v12 = vpack.c.bf16 %v788_v16, %v786_v29  ;;  %v810_v28 = vld [vmem:[#allocation7 + $0x360] sm:$0xff]  ;;  %v2172_v32 = vpack.c.bf16 %v813_v53, %v811_v59  ;;  %v827_v29 = vld [vmem:[#allocation7 + $0x3e8] sm:$0xff]  ;;  %v829_v16 = vld [vmem:[#allocation7 + $0x3f8] sm:$0xff] }
 0x19c   :  { %2415 = vsinq.f32 %v393_v17  ;;  %v791_v17 = vld [vmem:[#allocation7 + $0x2c8] sm:$0xff] }
 0x19d   :  { %v2410_v18 = vpop.eup %2409  ;;  %2137 = vmatprep.subr.bf16.mxu0 %v2136_v33  ;;  %v812_v33 = vld [vmem:[#allocation7 + $0x370] sm:$0xff] }
 0x19e   :  { %v2412_v19 = vpop.eup %2411  ;;  %v301_v23 = vxor.u32 2147483648, %v2410_v18  ;;  %2139 = vmatpush1.bf16.msra.mxu0 %v2138_v62  ;;  %v2174_v62 = vpack.c.bf16 %v812_v33, %v810_v28 }
 0x19f   :  { %v298_v24 = vxor.u32 2147483648, %v2412_v19  ;;  %2141 = vmatprep.subr.bf16.mxu0 %v2140_v2  ;;  %v816_v2 = vld [vmem:[#allocation7 + $0x390] sm:$0xff] }
 0x1a0   :  { %v302_v25 = vsel %vm300_vm2, %v301_v23, %v2412_v19  ;;  %v792_v23 = vld [vmem:[#allocation7 + $0x2d0] sm:$0xff] }
 0x1a1   :  { %v299_v31 = vsel %vm297_vm3, %v2410_v18, %v298_v24  ;;  %v793_v18 = vld [vmem:[#allocation7 + $0x2d8] sm:$0xff]  ;;  %v2154_v24 = vpack.c.bf16 %v792_v23, %v790_v21  ;;  %v474_v23 = vld [vmem:[#allocation10 + $0x1] ss:$8 sm:$0x3] }
 0x1a2   :  { %v303_v40 = vsel %vm296_vm4, %v299_v31, %v302_v25  ;;  %2143 = vmatpush1.bf16.msra.mxu0 %v2142_v5  ;;  %v2152_v19 = vpack.c.bf16 %v793_v18, %v791_v17  ;;  %v795_v25 = vld [vmem:[#allocation7 + $0x2e8] sm:$0xff]  ;;  %v2178_v5 = vpack.c.bf16 %v816_v2, %v814_v0  ;;  %v2188_v17 = vpack.c.bf16 %v829_v16, %v827_v29  ;;  %v826_v18 = vld [vmem:[#allocation7 + $0x3e0] sm:$0xff] }
 0x1a3   :  { %v304_v27 = vsel %vm293_vm5, nan, %v303_v40  ;;  %2145 = vmatprep.subr.bf16.mxu0 %v2144_v8  ;;  %v2156_v31 = vpack.c.bf16 %v797_v30, %v795_v25  ;;  %v794_v40 = vld [vmem:[#allocation7 + $0x2e0] sm:$0xff]  ;;  %v820_v8 = vld [vmem:[#allocation7 + $0x3b0] sm:$0xff]  ;;  %v483_v25 = vrot.slane %v474_v23, %v2711_v22 }
 0x1a5   :  { %v2414_v34 = vpop.eup %2413 }
 0x1a6   :  { %v2416_v35 = vpop.eup %2415  ;;  %v405_v36 = vxor.u32 2147483648, %v2414_v34  ;;  %2147 = vmatpush1.bf16.msra.mxu0 %v2146_v11  ;;  %v2182_v11 = vpack.c.bf16 %v820_v8, %v818_v7 }
 0x1a7   :  { %v402_v37 = vxor.u32 2147483648, %v2416_v35  ;;  %2149 = vmatprep.subr.bf16.mxu0 %v2148_v15  ;;  %v824_v15 = vld [vmem:[#allocation7 + $0x3d0] sm:$0xff] }
 0x1a8   :  { %v406_v38 = vsel %vm404_vm6, %v405_v36, %v2416_v35  ;;  %v801_v35 = vld [vmem:[#allocation7 + $0x318] sm:$0xff] }
 0x1a9   :  { %v403_v39 = vsel %vm401_vm7, %v2414_v34, %v402_v37  ;;  %v799_v34 = vld [vmem:[#allocation7 + $0x308] sm:$0xff]  ;;  %v798_v37 = vld [vmem:[#allocation7 + $0x300] sm:$0xff] }
 0x1aa   :  { %v407_v41 = vsel %vm400_vm8, %v403_v39, %v406_v38  ;;  %2151 = vmatpush1.bf16.msra.mxu0 %v2150_v12  ;;  %v2160_v36 = vpack.c.bf16 %v801_v35, %v799_v34  ;;  %v800_v38 = vld [vmem:[#allocation7 + $0x310] sm:$0xff]  ;;  %v2186_v12 = vpack.c.bf16 %v824_v15, %v822_v14 }
 0x1ab   :  { %v408_v42 = vsel %vm397_vm9, nan, %v407_v41  ;;  %2153 = vmatprep.subr.bf16.mxu0 %v2152_v19  ;;  %v2162_v39 = vpack.c.bf16 %v800_v38, %v798_v37  ;;  %v803_v41 = vld [vmem:[#allocation7 + $0x328] sm:$0xff]  ;;  %v828_v19 = vld [vmem:[#allocation7 + $0x3f0] sm:$0xff] }
 0x1ac   :  { %550 = vmatprep.mubr.f32.mxu1 %v408_v42  ;;  %v805_v42 = vld [vmem:[#allocation7 + $0x338] sm:$0xff]  ;;  %v2190_v21 = vpack.c.bf16 %v828_v19, %v826_v18 }
 0x1ad   :  { %551 = vmatmul.mubr.f32.vlgmr.msra.gmra.mrb[0].mxu1 %v304_v27  ;;  %v796_v27 = vld [vmem:[#allocation7 + $0x2f0] sm:$0xff]  ;;  %v2164_v43 = vpack.c.bf16 %v805_v42, %v803_v41 }
 0x1ae   :  { %2155 = vmatpush1.bf16.msra.mxu0 %v2154_v24  ;;  %v2158_v46 = vpack.c.bf16 %v796_v27, %v794_v40  ;;  %v479_v24 = vrot.slane %v474_v23, %v2709_v20 }
 0x1af   :  { %2157 = vmatprep.subr.bf16.mxu0 %v2156_v31 }
 0x1b2   :  { %2159 = vmatpush1.bf16.msra.mxu0 %v2158_v46 }
 0x1b3   :  { %2161 = vmatprep.subr.bf16.mxu0 %v2160_v36 }
 0x1b6   :  { %2163 = vmatpush1.bf16.msra.mxu0 %v2162_v39 }
 0x1b7   :  { %2165 = vmatprep.subr.bf16.mxu0 %v2164_v43 }
 0x1ba   :  { %2167 = vmatpush1.bf16.msra.mxu0 %v2166_v45 }
 0x1bb   :  { %2169 = vmatprep.subr.bf16.mxu0 %v2168_v50 }
 0x1be   :  { %2171 = vmatpush1.bf16.msra.mxu0 %v2170_v57 }
 0x1bf   :  { %2173 = vmatprep.subr.bf16.mxu0 %v2172_v32 }
 0x1c2   :  { %2175 = vmatpush1.bf16.msra.mxu0 %v2174_v62 }
 0x1c3   :  { %2177 = vmatprep.subr.bf16.mxu0 %v2176_v63 }
 0x1c6   :  { %2179 = vmatpush1.bf16.msra.mxu0 %v2178_v5 }
 0x1c7   :  { %2181 = vmatprep.subr.bf16.mxu0 %v2180_v6 }
 0x1ca   :  { %2183 = vmatpush1.bf16.msra.mxu0 %v2182_v11 }
 0x1cb   :  { %2185 = vmatprep.subr.bf16.mxu0 %v2184_v13 }
 0x1ce   :  { %2187 = vmatpush1.bf16.msra.mxu0 %v2186_v12 }
 0x1cf   :  { %2189 = vmatprep.subr.bf16.mxu0 %v2188_v17 }
 0x1d2   :  { %2191 = vmatpush1.bf16.msra.mxu0 %v2190_v21 }
 0x280   :  { %v552_v30 = vpop.f32.mrb[0].mxu1 }
 0x281   :  { %v2816_v31 = vadd.f32 %v552_v30, %v479_v24  ;;  %v554_v40 = vpop.f32.mrb[1].mxu1 }
 0x282   :  { %v2818_v27 = vadd.f32 %v554_v40, %v483_v25 }
 0x283   :  { %v557_v46 = vand.u32 2147483647, %v2816_v31  ;;  %v560_v34 = vand.u32 2139095040, %v2816_v31  ;;  %vm559_vm8 = vcmp.lt.s32.totalorder %v2816_v31, 0 }
 0x284   :  { %v664_v35 = vand.u32 2139095040, %v2818_v27  ;;  %v661_v38 = vand.u32 2147483647, %v2818_v27 }
 0x285   :  { %v561_v36 = vshrl.u32 %v560_v34, 23  ;;  %v564_v37 = vand.u32 8388607, %v557_v46  ;;  %vm558_vm9 = vcmp.le.f32.partialorder %v557_v46, 0.7853982 }
 0x286   :  { %v665_v39 = vshrl.u32 %v664_v35, 23  ;;  %v668_v44 = vand.u32 8388607, %v661_v38 }
 0x287   :  { %v1965_v41 = vadd.s32 4294967169, %v561_v36  ;;  %v565_v26 = vor.u32 8388608, %v564_v37 }
 0x288   :  { %v1969_v42 = vadd.s32 4294967169, %v665_v39  ;;  %v669_v57 = vor.u32 8388608, %v668_v44 }
 0x289   :  { %v567_v43 = vadd.s32 1, %v1965_v41  ;;  %v2828_v55 = vshll.u32 %v565_v26, 8 }
 0x28a   :  { %v671_v45 = vadd.s32 1, %v1969_v42 }
 0x28b   :  { %vm568_vm10 = vcmp.gt.s32.totalorder %v567_v43, 0 }
 0x28c   :  { %v569_v47 = vsel %vm568_vm10, %v567_v43, 0  ;;  %vm672_vm11 = vcmp.gt.s32.totalorder %v671_v45, 0  ;;  %vm663_vm10 = vcmp.lt.s32.totalorder %v2818_v27, 0 }
 0x28d   :  { %v570_v48 = vshrl.u32 %v569_v47, 5  ;;  %v571_v50 = vand.u32 31, %v569_v47  ;;  %v673_v52 = vsel %vm672_vm11, %v671_v45, 0  ;;  %vm662_vm11 = vcmp.le.f32.partialorder %v661_v38, 0.7853982 }
 0x28e   :  { %v2831_v28 = vshrl.u32 %v673_v52, 5  ;;  %v675_v32 = vand.u32 31, %v673_v52 }
 0x28f   :  { %v572_v59 = vsub.s32 32, %v571_v50  ;;  %v574_v53 = vshll.u32 %v2599_v49, %v571_v50  ;;  %v577_v33 = vshll.u32 %v2600_v51, %v571_v50  ;;  %v580_v60 = vshll.u32 %v2601_v54, %v571_v50 }
 0x290   :  { %v583_v61 = vshll.u32 %v2602_v56, %v571_v50  ;;  %v586_v62 = vshll.u32 %v2603_v58, %v571_v50  ;;  %vm589_vm12 = vcmp.lt.s32.totalorder %v570_v48, 1  ;;  %vm590_vm13 = vcmp.lt.s32.totalorder %v570_v48, 2 }
 0x291   :  { %v575_v63 = vshrl.u32 %v2600_v51, %v572_v59  ;;  %v578_v0 = vshrl.u32 %v2601_v54, %v572_v59  ;;  %v581_v2 = vshrl.u32 %v2602_v56, %v572_v59  ;;  %v573_v3 = vshrl.u32 %v2599_v49, %v572_v59 }
 0x292   :  { %v584_v4 = vshrl.u32 %v2603_v58, %v572_v59  ;;  %v587_v5 = vshrl.u32 %v2604_v1, %v572_v59  ;;  %v676_v9 = vsub.s32 32, %v675_v32  ;;  %vm591_vm14 = vcmp.lt.s32.totalorder %v570_v48, 3 }
 0x293   :  { %v576_v6 = vor.u32 %v575_v63, %v574_v53  ;;  %v579_v7 = vor.u32 %v578_v0, %v577_v33  ;;  %v582_v8 = vor.u32 %v581_v2, %v580_v60  ;;  %vm592_vm15 = vcmp.lt.s32.totalorder %v570_v48, 4 }
 0x294   :  { %v585_v10 = vor.u32 %v584_v4, %v583_v61  ;;  %v588_v11 = vor.u32 %v587_v5, %v586_v62  ;;  %v678_v18 = vshll.u32 %v2599_v49, %v675_v32  ;;  %v679_v23 = vshrl.u32 %v2600_v51, %v676_v9 }
 0x295   :  { %v593_v13 = vsel %vm589_vm12, %v573_v3, %v576_v6  ;;  %v594_v14 = vsel %vm592_vm15, %v582_v8, 2102212464  ;;  %v597_v15 = vsel %vm589_vm12, %v576_v6, %v579_v7  ;;  %v601_v29 = vsel %vm589_vm12, %v579_v7, %v582_v8 }
 0x296   :  { %v595_v16 = vsel %vm591_vm14, %v579_v7, %v594_v14  ;;  %v598_v12 = vsel %vm592_vm15, %v585_v10, 920167782  ;;  %v602_v17 = vsel %vm592_vm15, %v588_v11, 1326507024  ;;  %v681_v24 = vshll.u32 %v2600_v51, %v675_v32 }
 0x297   :  { %v599_v19 = vsel %vm591_vm14, %v582_v8, %v598_v12  ;;  %v603_v21 = vsel %vm591_vm14, %v585_v10, %v602_v17  ;;  %v596_v25 = vsel %vm590_vm13, %v593_v13, %v595_v16  ;;  %v682_v34 = vshrl.u32 %v2601_v54, %v676_v9 }
 0x298   :  { %v600_v30 = vsel %vm590_vm13, %v597_v15, %v599_v19  ;;  %v604_v40 = vsel %vm590_vm13, %v601_v29, %v603_v21  ;;  %v680_v41 = vor.u32 %v679_v23, %v678_v18  ;;  %v684_v43 = vshll.u32 %v2601_v54, %v675_v32 }
 0x299   :  { %v2854_v35 = vmul.u32.u64.low %v2828_v55, %v604_v40  ;;  %v2855_v36 = vmul.u32.u64.high %v2828_v55, %v604_v40, %v2854_v35  ;;  %v2858_v37 = vmul.u32.u64.low %v2828_v55, %v600_v30  ;;  %v2859_v39 = vmul.u32.u64.high %v2828_v55, %v600_v30, %v2858_v37 }
 0x29a   :  { %v683_v42 = vor.u32 %v682_v34, %v681_v24  ;;  %v685_v26 = vshrl.u32 %v2602_v56, %v676_v9  ;;  %v687_v44 = vshll.u32 %v2602_v56, %v675_v32  ;;  %v688_v45 = vshrl.u32 %v2603_v58, %v676_v9 }
 0x29b   :  { %v691_v47 = vshrl.u32 %v2604_v1, %v676_v9  ;;  %v709_v48 = vshll.u32 %v669_v57, 8  ;;  %v612_v50 = vmul.u32 %v2828_v55, %v596_v25  ;;  %v677_v52 = vshrl.u32 %v2599_v49, %v676_v9 }
 0x29c   :  { %v686_v59 = vor.u32 %v685_v26, %v684_v43  ;;  %v690_v53 = vshll.u32 %v2603_v58, %v675_v32  ;;  %vm614_vm0 = vc.u32 %v2855_v36, %v2858_v37  ;;  %v615_v33 = vadd.s32 1, %v2859_v39 }
 0x29d   :  { %v689_v60 = vor.u32 %v688_v45, %v687_v44  ;;  %vm693_vm1 = vcmp.lt.s32.totalorder %v2831_v28, 1  ;;  %vm695_vm2 = vcmp.lt.s32.totalorder %v2831_v28, 3  ;;  %vm696_vm3 = vcmp.lt.s32.totalorder %v2831_v28, 4 }
 0x29e   :  { %v692_v61 = vor.u32 %v691_v47, %v690_v53  ;;  %v701_v57 = vsel %vm693_vm1, %v680_v41, %v683_v42  ;;  %v616_v55 = vsel %vm614_vm0, %v615_v33, %v2859_v39  ;;  %v698_v62 = vsel %vm696_vm3, %v686_v59, 2102212464 }
 0x29f   :  { %v702_v63 = vsel %vm696_vm3, %v689_v60, 920167782  ;;  %v705_v0 = vsel %vm693_vm1, %v683_v42, %v686_v59  ;;  %v617_v2 = vadd.s32 %v616_v55, %v612_v50  ;;  %vm694_vm4 = vcmp.lt.s32.totalorder %v2831_v28, 2 }
 0x2a0   :  { %v703_v32 = vsel %vm695_vm2, %v686_v59, %v702_v63  ;;  %v706_v3 = vsel %vm696_vm3, %v692_v61, 1326507024  ;;  %v697_v4 = vsel %vm693_vm1, %v677_v52, %v680_v41  ;;  %v699_v5 = vsel %vm695_vm2, %v683_v42, %v698_v62 }
 0x2a1   :  { %v704_v6 = vsel %vm694_vm4, %v701_v57, %v703_v32  ;;  %v707_v7 = vsel %vm695_vm2, %v689_v60, %v706_v3  ;;  %v618_v8 = vadd.s32 536870912, %v617_v2  ;;  %v700_v29 = vsel %vm694_vm4, %v697_v4, %v699_v5 }
 0x2a2   :  { %v708_v9 = vsel %vm694_vm4, %v705_v0, %v707_v7  ;;  %v2876_v10 = vmul.u32.u64.low %v709_v48, %v704_v6  ;;  %v2877_v11 = vmul.u32.u64.high %v709_v48, %v704_v6, %v2876_v10  ;;  %v716_v28 = vmul.u32 %v709_v48, %v700_v29 }
 0x2a3   :  { %v2879_v13 = vmul.u32.u64.low %v709_v48, %v708_v9  ;;  %v2880_v14 = vmul.u32.u64.high %v709_v48, %v708_v9, %v2879_v13  ;;  %v619_v15 = vshrl.u32 %v618_v8, 30  ;;  %v613_v42 = vadd.s32 %v2858_v37, %v2855_v36 }
 0x2a4   :  { %v719_v12 = vadd.s32 1, %v2877_v11  ;;  %vm649_vm15 = vweird.f32 %v2816_v31  ;;  %vm753_vm3 = vweird.f32 %v2818_v27 }
 0x2a5   :  { %v620_v16 = vshll.u32 %v619_v15, 30  ;;  %vm718_vm5 = vc.u32 %v2880_v14, %v2876_v10  ;;  %v717_v55 = vadd.s32 %v2876_v10, %v2880_v14  ;;  %v643_v37 = vsub.s32 4, %v619_v15 }
 0x2a6   :  { %v720_v18 = vsel %vm718_vm5, %v719_v12, %v2877_v11 }
 0x2a7   :  { %v621_v17 = vsub.s32 %v617_v2, %v620_v16  ;;  %v721_v19 = vadd.s32 %v720_v18, %v716_v28  ;;  %v644_v7 = vsel %vm559_vm8, %v643_v37, %v619_v15  ;;  %v1131_v37 = vld [vmem:[#allocation7 + $0x440] sm:$0xff] }
 0x2a8   :  { %v646_v13 = vsel %vm558_vm9, 0, %v644_v7 }
 0x2a9   :  { %v623_v21 = vsub.s32 0, %v621_v17  ;;  %v722_v23 = vadd.s32 536870912, %v721_v19  ;;  %v650_v16 = vadd.s32 3, %v646_v13  ;;  %v1141_v13 = vld [vmem:[#allocation7 + $0x490] sm:$0xff] }
 0x2ab   :  { %v1966_v24 = vmin.u32 %v623_v21, %v621_v17  ;;  %v723_v25 = vshrl.u32 %v722_v23, 30 }
 0x2ad   :  { %v625_v30 = vclz %v1966_v24  ;;  %v724_v40 = vshll.u32 %v723_v25, 30  ;;  %v747_v29 = vsub.s32 4, %v723_v25 }
 0x2af   :  { %v1967_v34 = vadd.s32 4294967294, %v625_v30  ;;  %v725_v35 = vsub.s32 %v721_v19, %v724_v40  ;;  %v748_v46 = vsel %vm663_vm10, %v747_v29, %v723_v25  ;;  %v1144_v29 = vld [vmem:[#allocation7 + $0x4a8] sm:$0xff] }
 0x2b0   :  { %v750_v19 = vsel %vm662_vm11, 0, %v748_v46  ;;  %v1145_v46 = vld [vmem:[#allocation7 + $0x4b0] sm:$0xff] }
 0x2b1   :  { %vm1968_vm6 = vcmp.lt.s32.totalorder %v1967_v34, 0  ;;  %v727_v41 = vsub.s32 0, %v725_v35  ;;  %v754_v30 = vadd.s32 3, %v750_v19 }
 0x2b2   :  { %v628_v39 = vsel %vm1968_vm6, 0, %v1967_v34 }
 0x2b3   :  { %v629_v43 = vsub.s32 32, %v628_v39  ;;  %v633_v26 = vsub.s32 4294967266, %v628_v39  ;;  %v1970_v44 = vmin.u32 %v727_v41, %v725_v35  ;;  %v630_v45 = vshll.u32 %v621_v17, %v628_v39 }
 0x2b4   :  { %v651_v17 = vand.u32 3, %v650_v16  ;;  %v1146_v16 = vld [vmem:[#allocation7 + $0x4b8] sm:$0xff] }
 0x2b5   :  { %v631_v47 = vshrl.u32 %v613_v42, %v629_v43  ;;  %v634_v48 = vadd.s32 127, %v633_v26  ;;  %v729_v50 = vclz %v1970_v44 }
 0x2b6   :  { %vm656_vm12 = vcmp.eq.s32.totalorder %v651_v17, 2  ;;  %vm653_vm13 = vcmp.eq.s32.totalorder %v651_v17, 0  ;;  %vm652_vm14 = vcmp.lt.s32.totalorder %v651_v17, 2  ;;  %v1148_v17 = vld [vmem:[#allocation7 + $0x4c8] sm:$0xff] }
 0x2b7   :  { %v632_v52 = vor.u32 %v631_v47, %v630_v45  ;;  %v635_v59 = vshll.u32 %v634_v48, 23  ;;  %v1971_v53 = vadd.s32 4294967294, %v729_v50  ;;  %v1124_v48 = vld [vmem:[#allocation7 + $0x408] sm:$0xff] }
 0x2b9   :  { %v636_v33 = vor.u32 4788187, %v635_v59  ;;  %vm1972_vm7 = vcmp.lt.s32.totalorder %v1971_v53, 0  ;;  %v639_v61 = vcvt.s32.f32 %v632_v52  ;;  %v1123_v52 = vld [vmem:[#allocation7 + $0x400] sm:$0xff]  ;;  %v1125_v59 = vld [vmem:[#allocation7 + $0x410] sm:$0xff] }
 0x2ba   :  { %v732_v57 = vsel %vm1972_vm7, 0, %v1971_v53  ;;  %v2194_v53 = vpack.c.bf16 %v1125_v59, %v1123_v52  ;;  %v1164_v59 = vld [vmem:[#allocation7 + $0x548] sm:$0xff] }
 0x2bb   :  { %v637_v60 = vand.u32 2147483647, %v636_v33  ;;  %v733_v62 = vsub.s32 32, %v732_v57  ;;  %v737_v63 = vsub.s32 4294967266, %v732_v57  ;;  %v734_v0 = vshll.u32 %v725_v35, %v732_v57  ;;  %v1128_v33 = vld [vmem:[#allocation7 + $0x428] sm:$0xff]  ;;  %v1127_v57 = vld [vmem:[#allocation7 + $0x420] sm:$0xff] }
 0x2bc   :  { %v755_v35 = vand.u32 3, %v754_v30  ;;  %v1152_v30 = vld [vmem:[#allocation7 + $0x4e8] sm:$0xff] }
 0x2bd   :  { %v640_v36 = vmul.f32 %v639_v61, %v637_v60  ;;  %v735_v2 = vshrl.u32 %v717_v55, %v733_v62  ;;  %v738_v32 = vadd.s32 127, %v737_v63  ;;  %v1130_v60 = vld [vmem:[#allocation7 + $0x438] sm:$0xff]  ;;  %v1129_v55 = vld [vmem:[#allocation7 + $0x430] sm:$0xff] }
 0x2be   :  { %vm760_vm0 = vcmp.eq.s32.totalorder %v755_v35, 2  ;;  %vm757_vm1 = vcmp.eq.s32.totalorder %v755_v35, 0  ;;  %vm756_vm2 = vcmp.lt.s32.totalorder %v755_v35, 2  ;;  %v2196_v61 = vpack.c.bf16 %v1130_v60, %v1128_v33  ;;  %v1134_v63 = vld [vmem:[#allocation7 + $0x458] sm:$0xff]  ;;  %v1163_v60 = vld [vmem:[#allocation7 + $0x540] sm:$0xff] }
 0x2bf   :  { %v641_v3 = vxor.u32 2147483648, %v640_v36  ;;  %v736_v4 = vor.u32 %v735_v2, %v734_v0  ;;  %v739_v5 = vshll.u32 %v738_v32, 23  ;;  %v2198_v62 = vpack.c.bf16 %v1129_v55, %v1127_v57  ;;  %v1133_v0 = vld [vmem:[#allocation7 + $0x450] sm:$0xff]  ;;  %v1136_v32 = vld [vmem:[#allocation7 + $0x468] sm:$0xff] }
 0x2c0   :  { %v2202_v2 = vpack.c.bf16 %v1133_v0, %v1131_v37  ;;  %v1168_v55 = vld [vmem:[#allocation7 + $0x568] sm:$0xff]  ;;  %v1174_v0 = vld [vmem:[#allocation7 + $0x598] sm:$0xff] }
 0x2c1   :  { %v642_v6 = vsel %vm559_vm8, %v641_v3, %v640_v36  ;;  %v740_v9 = vor.u32 4788187, %v739_v5  ;;  %v743_v11 = vcvt.s32.f32 %v736_v4  ;;  %v1138_v3 = vld [vmem:[#allocation7 + $0x478] sm:$0xff]  ;;  %v1135_v5 = vld [vmem:[#allocation7 + $0x460] sm:$0xff]  ;;  %v1172_v37 = vld [vmem:[#allocation7 + $0x588] sm:$0xff] }
 0x2c2   :  { %v645_v8 = vsel %vm558_vm9, %v2816_v31, %v642_v6  ;;  %v1126_v31 = vld [vmem:[#allocation7 + $0x418] sm:$0xff]  ;;  %v2204_v4 = vpack.c.bf16 %v1138_v3, %v1136_v32  ;;  %v1137_v6 = vld [vmem:[#allocation7 + $0x470] sm:$0xff]  ;;  %v2240_v32 = vpack.c.bf16 %v1174_v0, %v1172_v37  ;;  %v1171_v3 = vld [vmem:[#allocation7 + $0x580] sm:$0xff] }
 0x2c3   :  { %2417 = vcosq.f32 %v645_v8  ;;  %v741_v10 = vand.u32 2147483647, %v740_v9  ;;  %v2192_v50 = vpack.c.bf16 %v1126_v31, %v1124_v48  ;;  %v2206_v7 = vpack.c.bf16 %v1137_v6, %v1135_v5  ;;  %v1142_v9 = vld [vmem:[#allocation7 + $0x498] sm:$0xff]  ;;  %v1159_v31 = vld [vmem:[#allocation7 + $0x520] sm:$0xff]  ;;  %v1176_v5 = vld [vmem:[#allocation7 + $0x5a8] sm:$0xff] }
 0x2c4   :  { %2419 = vsinq.f32 %v645_v8  ;;  %v1140_v8 = vld [vmem:[#allocation7 + $0x488] sm:$0xff]  ;;  %v1178_v6 = vld [vmem:[#allocation7 + $0x5b8] sm:$0xff] }
 0x2c5   :  { %v744_v14 = vmul.f32 %v743_v11, %v741_v10  ;;  %2193 = vmatprep.subr.bf16.mxu1 %v2192_v50  ;;  %v2208_v10 = vpack.c.bf16 %v1142_v9, %v1140_v8  ;;  %v1139_v11 = vld [vmem:[#allocation7 + $0x480] sm:$0xff]  ;;  %v1161_v50 = vld [vmem:[#allocation7 + $0x530] sm:$0xff]  ;;  %v2244_v8 = vpack.c.bf16 %v1178_v6, %v1176_v5 }
 0x2c6   :  { %2195 = vmatpush1.bf16.msra.mxu1 %v2194_v53  ;;  %v2230_v52 = vpack.c.bf16 %v1161_v50, %v1159_v31  ;;  %v1166_v53 = vld [vmem:[#allocation7 + $0x558] sm:$0xff]  ;;  %v1175_v9 = vld [vmem:[#allocation7 + $0x5a0] sm:$0xff] }
 0x2c7   :  { %v745_v12 = vxor.u32 2147483648, %v744_v14  ;;  %2197 = vmatprep.subr.bf16.mxu1 %v2196_v61  ;;  %v2232_v33 = vpack.c.bf16 %v1166_v53, %v1164_v59  ;;  %v1165_v61 = vld [vmem:[#allocation7 + $0x550] sm:$0xff] }
 0x2c8   :  { %v2234_v57 = vpack.c.bf16 %v1165_v61, %v1163_v60 }
 0x2c9   :  { %v746_v28 = vsel %vm663_vm10, %v745_v12, %v744_v14  ;;  %v2210_v14 = vpack.c.bf16 %v1141_v13, %v1139_v11  ;;  %v2212_v12 = vpack.c.bf16 %v1146_v16, %v1144_v29  ;;  %v1180_v11 = vld [vmem:[#allocation7 + $0x5c8] sm:$0xff]  ;;  %v1182_v13 = vld [vmem:[#allocation7 + $0x5d8] sm:$0xff]  ;;  %v1179_v16 = vld [vmem:[#allocation7 + $0x5c0] sm:$0xff] }
 0x2ca   :  { %v749_v15 = vsel %vm662_vm11, %v2818_v27, %v746_v28  ;;  %2199 = vmatpush1.bf16.msra.mxu1 %v2198_v62  ;;  %v1132_v27 = vld [vmem:[#allocation7 + $0x448] sm:$0xff]  ;;  %v1143_v28 = vld [vmem:[#allocation7 + $0x4a0] sm:$0xff]  ;;  %v1170_v62 = vld [vmem:[#allocation7 + $0x578] sm:$0xff]  ;;  %v2248_v29 = vpack.c.bf16 %v1182_v13, %v1180_v11 }
 0x2cb   :  { %2421 = vcosq.f32 %v749_v15  ;;  %v2200_v36 = vpack.c.bf16 %v1134_v63, %v1132_v27  ;;  %v1167_v27 = vld [vmem:[#allocation7 + $0x560] sm:$0xff]  ;;  %v2236_v63 = vpack.c.bf16 %v1170_v62, %v1168_v55 }
 0x2cc   :  { %2423 = vsinq.f32 %v749_v15  ;;  %v2214_v15 = vpack.c.bf16 %v1145_v46, %v1143_v28  ;;  %v1184_v28 = vld [vmem:[#allocation7 + $0x5e8] sm:$0xff]  ;;  %v1186_v46 = vld [vmem:[#allocation7 + $0x5f8] sm:$0xff] }
 0x2cd   :  { %v2418_v18 = vpop.eup %2417  ;;  %2201 = vmatprep.subr.bf16.mxu1 %v2200_v36  ;;  %v1169_v36 = vld [vmem:[#allocation7 + $0x570] sm:$0xff] }
 0x2ce   :  { %v2420_v21 = vpop.eup %2419  ;;  %v657_v23 = vxor.u32 2147483648, %v2418_v18  ;;  %2203 = vmatpush1.bf16.msra.mxu1 %v2202_v2  ;;  %v2238_v2 = vpack.c.bf16 %v1169_v36, %v1167_v27 }
 0x2cf   :  { %v654_v24 = vxor.u32 2147483648, %v2420_v21  ;;  %2205 = vmatprep.subr.bf16.mxu1 %v2204_v4  ;;  %v1173_v4 = vld [vmem:[#allocation7 + $0x590] sm:$0xff] }
 0x2d0   :  { %v658_v40 = vsel %vm656_vm12, %v657_v23, %v2420_v21  ;;  %v1147_v21 = vld [vmem:[#allocation7 + $0x4c0] sm:$0xff]  ;;  %v1149_v23 = vld [vmem:[#allocation7 + $0x4d0] sm:$0xff] }
 0x2d1   :  { %v655_v34 = vsel %vm653_vm13, %v2418_v18, %v654_v24  ;;  %v1150_v18 = vld [vmem:[#allocation7 + $0x4d8] sm:$0xff]  ;;  %v2218_v24 = vpack.c.bf16 %v1149_v23, %v1147_v21  ;;  %v831_v23 = vld [vmem:[#allocation10 + $0x2] ss:$8 sm:$0x3] }
 0x2d2   :  { %v659_v38 = vsel %vm652_vm14, %v655_v34, %v658_v40  ;;  %2207 = vmatpush1.bf16.msra.mxu1 %v2206_v7  ;;  %v2216_v19 = vpack.c.bf16 %v1150_v18, %v1148_v17  ;;  %v1154_v40 = vld [vmem:[#allocation7 + $0x4f8] sm:$0xff]  ;;  %v2242_v7 = vpack.c.bf16 %v1173_v4, %v1171_v3  ;;  %v2252_v17 = vpack.c.bf16 %v1186_v46, %v1184_v28  ;;  %v1183_v18 = vld [vmem:[#allocation7 + $0x5e0] sm:$0xff] }
 0x2d3   :  { %v660_v25 = vsel %vm649_vm15, nan, %v659_v38  ;;  %2209 = vmatprep.subr.bf16.mxu1 %v2208_v10  ;;  %v2220_v34 = vpack.c.bf16 %v1154_v40, %v1152_v30  ;;  %v1151_v38 = vld [vmem:[#allocation7 + $0x4e0] sm:$0xff]  ;;  %v1177_v10 = vld [vmem:[#allocation7 + $0x5b0] sm:$0xff]  ;;  %v840_v30 = vrot.slane %v831_v23, %v2711_v22 }
 0x2d5   :  { %v2422_v39 = vpop.eup %2421 }
 0x2d6   :  { %v2424_v41 = vpop.eup %2423  ;;  %v761_v42 = vxor.u32 2147483648, %v2422_v39  ;;  %2211 = vmatpush1.bf16.msra.mxu1 %v2210_v14  ;;  %v2246_v14 = vpack.c.bf16 %v1177_v10, %v1175_v9 }
 0x2d7   :  { %v758_v43 = vxor.u32 2147483648, %v2424_v41  ;;  %2213 = vmatprep.subr.bf16.mxu1 %v2212_v12  ;;  %v1181_v12 = vld [vmem:[#allocation7 + $0x5d0] sm:$0xff] }
 0x2d8   :  { %v762_v26 = vsel %vm760_vm0, %v761_v42, %v2424_v41  ;;  %v1158_v41 = vld [vmem:[#allocation7 + $0x518] sm:$0xff] }
 0x2d9   :  { %v759_v44 = vsel %vm757_vm1, %v2422_v39, %v758_v43  ;;  %v1156_v39 = vld [vmem:[#allocation7 + $0x508] sm:$0xff]  ;;  %v1155_v43 = vld [vmem:[#allocation7 + $0x500] sm:$0xff] }
 0x2da   :  { %v763_v45 = vsel %vm756_vm2, %v759_v44, %v762_v26  ;;  %2215 = vmatpush1.bf16.msra.mxu1 %v2214_v15  ;;  %v2224_v42 = vpack.c.bf16 %v1158_v41, %v1156_v39  ;;  %v1157_v26 = vld [vmem:[#allocation7 + $0x510] sm:$0xff]  ;;  %v2250_v15 = vpack.c.bf16 %v1181_v12, %v1179_v16 }
 0x2db   :  { %v764_v47 = vsel %vm753_vm3, nan, %v763_v45  ;;  %2217 = vmatprep.subr.bf16.mxu1 %v2216_v19  ;;  %v2226_v44 = vpack.c.bf16 %v1157_v26, %v1155_v43  ;;  %v1160_v45 = vld [vmem:[#allocation7 + $0x528] sm:$0xff]  ;;  %v1185_v19 = vld [vmem:[#allocation7 + $0x5f0] sm:$0xff] }
 0x2dc   :  { %907 = vmatprep.mubr.f32.mxu0 %v764_v47  ;;  %v1162_v47 = vld [vmem:[#allocation7 + $0x538] sm:$0xff]  ;;  %v2254_v21 = vpack.c.bf16 %v1185_v19, %v1183_v18 }
 0x2dd   :  { %908 = vmatmul.mubr.f32.vlgmr.msra.gmra.mrb[2].mxu0 %v660_v25  ;;  %v1153_v25 = vld [vmem:[#allocation7 + $0x4f0] sm:$0xff]  ;;  %v2228_v48 = vpack.c.bf16 %v1162_v47, %v1160_v45 }
 0x2de   :  { %2219 = vmatpush1.bf16.msra.mxu1 %v2218_v24  ;;  %v2222_v35 = vpack.c.bf16 %v1153_v25, %v1151_v38  ;;  %v836_v24 = vrot.slane %v831_v23, %v2709_v20 }
 0x2df   :  { %2221 = vmatprep.subr.bf16.mxu1 %v2220_v34 }
 0x2e2   :  { %2223 = vmatpush1.bf16.msra.mxu1 %v2222_v35 }
 0x2e3   :  { %2225 = vmatprep.subr.bf16.mxu1 %v2224_v42 }
 0x2e6   :  { %2227 = vmatpush1.bf16.msra.mxu1 %v2226_v44 }
 0x2e7   :  { %2229 = vmatprep.subr.bf16.mxu1 %v2228_v48 }
 0x2ea   :  { %2231 = vmatpush1.bf16.msra.mxu1 %v2230_v52 }
 0x2eb   :  { %2233 = vmatprep.subr.bf16.mxu1 %v2232_v33 }
 0x2ee   :  { %2235 = vmatpush1.bf16.msra.mxu1 %v2234_v57 }
 0x2ef   :  { %2237 = vmatprep.subr.bf16.mxu1 %v2236_v63 }
 0x2f2   :  { %2239 = vmatpush1.bf16.msra.mxu1 %v2238_v2 }
 0x2f3   :  { %2241 = vmatprep.subr.bf16.mxu1 %v2240_v32 }
 0x2f6   :  { %2243 = vmatpush1.bf16.msra.mxu1 %v2242_v7 }
 0x2f7   :  { %2245 = vmatprep.subr.bf16.mxu1 %v2244_v8 }
 0x2fa   :  { %2247 = vmatpush1.bf16.msra.mxu1 %v2246_v14 }
 0x2fb   :  { %2249 = vmatprep.subr.bf16.mxu1 %v2248_v29 }
 0x2fe   :  { %2251 = vmatpush1.bf16.msra.mxu1 %v2250_v15 }
 0x2ff   :  { %2253 = vmatprep.subr.bf16.mxu1 %v2252_v17 }
 0x302   :  { %2255 = vmatpush1.bf16.msra.mxu1 %v2254_v21 }
 0x3b0   :  { %v909_v40 = vpop.f32.mrb[2].mxu0 }
 0x3b1   :  { %v2899_v34 = vadd.f32 %v909_v40, %v836_v24  ;;  %v911_v38 = vpop.f32.mrb[3].mxu0 }
 0x3b2   :  { %v2901_v25 = vadd.f32 %v911_v38, %v840_v30 }
 0x3b3   :  { %v914_v35 = vand.u32 2147483647, %v2899_v34  ;;  %v917_v39 = vand.u32 2139095040, %v2899_v34  ;;  %vm916_vm2 = vcmp.lt.s32.totalorder %v2899_v34, 0 }
 0x3b4   :  { %v1021_v41 = vand.u32 2139095040, %v2901_v25  ;;  %v1018_v26 = vand.u32 2147483647, %v2901_v25 }
 0x3b5   :  { %v918_v42 = vshrl.u32 %v917_v39, 23  ;;  %v921_v43 = vand.u32 8388607, %v914_v35  ;;  %vm915_vm3 = vcmp.le.f32.partialorder %v914_v35, 0.7853982 }
 0x3b6   :  { %v1022_v44 = vshrl.u32 %v1021_v41, 23  ;;  %v1025_v50 = vand.u32 8388607, %v1018_v26 }
 0x3b7   :  { %v1973_v45 = vadd.s32 4294967169, %v918_v42  ;;  %v922_v31 = vor.u32 8388608, %v921_v43 }
 0x3b8   :  { %v1977_v47 = vadd.s32 4294967169, %v1022_v44  ;;  %v1026_v57 = vor.u32 8388608, %v1025_v50 }
 0x3b9   :  { %v924_v48 = vadd.s32 1, %v1973_v45  ;;  %v2911_v61 = vshll.u32 %v922_v31, 8 }
 0x3ba   :  { %v1028_v52 = vadd.s32 1, %v1977_v47 }
 0x3bb   :  { %vm925_vm4 = vcmp.gt.s32.totalorder %v924_v48, 0 }
 0x3bc   :  { %v926_v59 = vsel %vm925_vm4, %v924_v48, 0  ;;  %vm1029_vm5 = vcmp.gt.s32.totalorder %v1028_v52, 0  ;;  %vm1020_vm4 = vcmp.lt.s32.totalorder %v2901_v25, 0 }
 0x3bd   :  { %v927_v53 = vshrl.u32 %v926_v59, 5  ;;  %v928_v33 = vand.u32 31, %v926_v59  ;;  %v1030_v60 = vsel %vm1029_vm5, %v1028_v52, 0  ;;  %vm1019_vm5 = vcmp.le.f32.partialorder %v1018_v26, 0.7853982 }
 0x3be   :  { %v2914_v27 = vshrl.u32 %v1030_v60, 5  ;;  %v1032_v63 = vand.u32 31, %v1030_v60 }
 0x3bf   :  { %v929_v55 = vsub.s32 32, %v928_v33  ;;  %v931_v62 = vshll.u32 %v2599_v49, %v928_v33  ;;  %v934_v36 = vshll.u32 %v2600_v51, %v928_v33  ;;  %v937_v37 = vshll.u32 %v2601_v54, %v928_v33 }
 0x3c0   :  { %v940_v0 = vshll.u32 %v2602_v56, %v928_v33  ;;  %v943_v2 = vshll.u32 %v2603_v58, %v928_v33  ;;  %vm946_vm6 = vcmp.lt.s32.totalorder %v927_v53, 1  ;;  %vm947_vm7 = vcmp.lt.s32.totalorder %v927_v53, 2 }
 0x3c1   :  { %v932_v32 = vshrl.u32 %v2600_v51, %v929_v55  ;;  %v935_v3 = vshrl.u32 %v2601_v54, %v929_v55  ;;  %v938_v4 = vshrl.u32 %v2602_v56, %v929_v55  ;;  %v930_v5 = vshrl.u32 %v2599_v49, %v929_v55 }
 0x3c2   :  { %v941_v6 = vshrl.u32 %v2603_v58, %v929_v55  ;;  %v944_v7 = vshrl.u32 %v2604_v1, %v929_v55  ;;  %v1033_v11 = vsub.s32 32, %v1032_v63  ;;  %vm948_vm8 = vcmp.lt.s32.totalorder %v927_v53, 3 }
 0x3c3   :  { %v933_v8 = vor.u32 %v932_v32, %v931_v62  ;;  %v936_v9 = vor.u32 %v935_v3, %v934_v36  ;;  %v939_v10 = vor.u32 %v938_v4, %v937_v37  ;;  %vm949_vm9 = vcmp.lt.s32.totalorder %v927_v53, 4 }
 0x3c4   :  { %v942_v13 = vor.u32 %v941_v6, %v940_v0  ;;  %v945_v14 = vor.u32 %v944_v7, %v943_v2  ;;  %v1035_v18 = vshll.u32 %v2599_v49, %v1032_v63  ;;  %v1036_v23 = vshrl.u32 %v2600_v51, %v1033_v11 }
 0x3c5   :  { %v950_v29 = vsel %vm946_vm6, %v930_v5, %v933_v8  ;;  %v951_v16 = vsel %vm949_vm9, %v939_v10, 2102212464  ;;  %v954_v12 = vsel %vm946_vm6, %v933_v8, %v936_v9  ;;  %v958_v28 = vsel %vm946_vm6, %v936_v9, %v939_v10 }
 0x3c6   :  { %v952_v46 = vsel %vm948_vm8, %v936_v9, %v951_v16  ;;  %v955_v15 = vsel %vm949_vm9, %v942_v13, 920167782  ;;  %v959_v17 = vsel %vm949_vm9, %v945_v14, 1326507024  ;;  %v1038_v24 = vshll.u32 %v2600_v51, %v1032_v63 }
 0x3c7   :  { %v956_v19 = vsel %vm948_vm8, %v939_v10, %v955_v15  ;;  %v960_v21 = vsel %vm948_vm8, %v942_v13, %v959_v17  ;;  %v953_v30 = vsel %vm947_vm7, %v950_v29, %v952_v46  ;;  %v1039_v39 = vshrl.u32 %v2601_v54, %v1033_v11 }
 0x3c8   :  { %v957_v40 = vsel %vm947_vm7, %v954_v12, %v956_v19  ;;  %v961_v38 = vsel %vm947_vm7, %v958_v28, %v960_v21  ;;  %v1037_v45 = vor.u32 %v1036_v23, %v1035_v18  ;;  %v1041_v48 = vshll.u32 %v2601_v54, %v1032_v63 }
 0x3c9   :  { %v2937_v41 = vmul.u32.u64.low %v2911_v61, %v961_v38  ;;  %v2938_v42 = vmul.u32.u64.high %v2911_v61, %v961_v38, %v2937_v41  ;;  %v2941_v43 = vmul.u32.u64.low %v2911_v61, %v957_v40  ;;  %v2942_v44 = vmul.u32.u64.high %v2911_v61, %v957_v40, %v2941_v43 }
 0x3ca   :  { %v1040_v47 = vor.u32 %v1039_v39, %v1038_v24  ;;  %v1042_v31 = vshrl.u32 %v2602_v56, %v1033_v11  ;;  %v1044_v50 = vshll.u32 %v2602_v56, %v1032_v63  ;;  %v1045_v52 = vshrl.u32 %v2603_v58, %v1033_v11 }
 0x3cb   :  { %v1048_v59 = vshrl.u32 %v2604_v1, %v1033_v11  ;;  %v1066_v53 = vshll.u32 %v1026_v57, 8  ;;  %v969_v33 = vmul.u32 %v2911_v61, %v953_v30  ;;  %v1034_v60 = vshrl.u32 %v2599_v49, %v1033_v11 }
 0x3cc   :  { %v1043_v55 = vor.u32 %v1042_v31, %v1041_v48  ;;  %v1047_v62 = vshll.u32 %v2603_v58, %v1032_v63  ;;  %vm971_vm10 = vc.u32 %v2938_v42, %v2941_v43  ;;  %v972_v36 = vadd.s32 1, %v2942_v44 }
 0x3cd   :  { %v1046_v37 = vor.u32 %v1045_v52, %v1044_v50  ;;  %vm1050_vm11 = vcmp.lt.s32.totalorder %v2914_v27, 1  ;;  %vm1052_vm12 = vcmp.lt.s32.totalorder %v2914_v27, 3  ;;  %vm1053_vm13 = vcmp.lt.s32.totalorder %v2914_v27, 4 }
 0x3ce   :  { %v1049_v0 = vor.u32 %v1048_v59, %v1047_v62  ;;  %v1058_v57 = vsel %vm1050_vm11, %v1037_v45, %v1040_v47  ;;  %v973_v61 = vsel %vm971_vm10, %v972_v36, %v2942_v44  ;;  %v1055_v2 = vsel %vm1053_vm13, %v1043_v55, 2102212464 }
 0x3cf   :  { %v1059_v32 = vsel %vm1053_vm13, %v1046_v37, 920167782  ;;  %v1062_v3 = vsel %vm1050_vm11, %v1040_v47, %v1043_v55  ;;  %v974_v4 = vadd.s32 %v973_v61, %v969_v33  ;;  %vm1051_vm14 = vcmp.lt.s32.totalorder %v2914_v27, 2 }
 0x3d0   :  { %v1060_v63 = vsel %vm1052_vm12, %v1043_v55, %v1059_v32  ;;  %v1063_v5 = vsel %vm1053_vm13, %v1049_v0, 1326507024  ;;  %v1054_v6 = vsel %vm1050_vm11, %v1034_v60, %v1037_v45  ;;  %v1056_v7 = vsel %vm1052_vm12, %v1040_v47, %v1055_v2 }
 0x3d1   :  { %v1061_v8 = vsel %vm1051_vm14, %v1058_v57, %v1060_v63  ;;  %v1064_v9 = vsel %vm1052_vm12, %v1046_v37, %v1063_v5  ;;  %v975_v10 = vadd.s32 536870912, %v974_v4  ;;  %v1057_v28 = vsel %vm1051_vm14, %v1054_v6, %v1056_v7 }
 0x3d2   :  { %v1065_v11 = vsel %vm1051_vm14, %v1062_v3, %v1064_v9  ;;  %v2959_v13 = vmul.u32.u64.low %v1066_v53, %v1061_v8  ;;  %v2960_v14 = vmul.u32.u64.high %v1066_v53, %v1061_v8, %v2959_v13  ;;  %v1073_v27 = vmul.u32 %v1066_v53, %v1057_v28 }
 0x3d3   :  { %v2962_v29 = vmul.u32.u64.low %v1066_v53, %v1065_v11  ;;  %v2963_v16 = vmul.u32.u64.high %v1066_v53, %v1065_v11, %v2962_v29  ;;  %v976_v12 = vshrl.u32 %v975_v10, 30  ;;  %v970_v47 = vadd.s32 %v2941_v43, %v2938_v42 }
 0x3d4   :  { %v1076_v15 = vadd.s32 1, %v2960_v14  ;;  %vm1006_vm9 = vweird.f32 %v2899_v34  ;;  %vm1110_vm13 = vweird.f32 %v2901_v25 }
 0x3d5   :  { %v977_v46 = vshll.u32 %v976_v12, 30  ;;  %vm1075_vm15 = vc.u32 %v2963_v16, %v2959_v13  ;;  %v1074_v61 = vadd.s32 %v2959_v13, %v2963_v16  ;;  %v1000_v43 = vsub.s32 4, %v976_v12 }
 0x3d6   :  { %v1077_v18 = vsel %vm1075_vm15, %v1076_v15, %v2960_v14 }
 0x3d7   :  { %v978_v17 = vsub.s32 %v974_v4, %v977_v46  ;;  %v1078_v19 = vadd.s32 %v1077_v18, %v1073_v27  ;;  %v1001_v9 = vsel %vm916_vm2, %v1000_v43, %v976_v12  ;;  %v1488_v43 = vld [vmem:[#allocation7 + $0x640] sm:$0xff] }
 0x3d8   :  { %v1003_v29 = vsel %vm915_vm3, 0, %v1001_v9 }
 0x3d9   :  { %v980_v21 = vsub.s32 0, %v978_v17  ;;  %v1079_v23 = vadd.s32 536870912, %v1078_v19  ;;  %v1007_v46 = vadd.s32 3, %v1003_v29  ;;  %v1498_v29 = vld [vmem:[#allocation7 + $0x690] sm:$0xff] }
 0x3db   :  { %v1974_v24 = vmin.u32 %v980_v21, %v978_v17  ;;  %v1080_v30 = vshrl.u32 %v1079_v23, 30 }
 0x3dd   :  { %v982_v40 = vclz %v1974_v24  ;;  %v1081_v38 = vshll.u32 %v1080_v30, 30  ;;  %v1104_v28 = vsub.s32 4, %v1080_v30 }
 0x3df   :  { %v1975_v39 = vadd.s32 4294967294, %v982_v40  ;;  %v1082_v41 = vsub.s32 %v1078_v19, %v1081_v38  ;;  %v1105_v35 = vsel %vm1020_vm4, %v1104_v28, %v1080_v30  ;;  %v1501_v28 = vld [vmem:[#allocation7 + $0x6a8] sm:$0xff] }
 0x3e0   :  { %v1107_v19 = vsel %vm1019_vm5, 0, %v1105_v35  ;;  %v1502_v35 = vld [vmem:[#allocation7 + $0x6b0] sm:$0xff] }
 0x3e1   :  { %vm1976_vm0 = vcmp.lt.s32.totalorder %v1975_v39, 0  ;;  %v1084_v45 = vsub.s32 0, %v1082_v41  ;;  %v1111_v40 = vadd.s32 3, %v1107_v19 }
 0x3e2   :  { %v985_v44 = vsel %vm1976_vm0, 0, %v1975_v39 }
 0x3e3   :  { %v986_v48 = vsub.s32 32, %v985_v44  ;;  %v990_v31 = vsub.s32 4294967266, %v985_v44  ;;  %v1978_v50 = vmin.u32 %v1084_v45, %v1082_v41  ;;  %v987_v52 = vshll.u32 %v978_v17, %v985_v44 }
 0x3e4   :  { %v1008_v17 = vand.u32 3, %v1007_v46  ;;  %v1503_v46 = vld [vmem:[#allocation7 + $0x6b8] sm:$0xff] }
 0x3e5   :  { %v988_v59 = vshrl.u32 %v970_v47, %v986_v48  ;;  %v991_v53 = vadd.s32 127, %v990_v31  ;;  %v1086_v33 = vclz %v1978_v50 }
 0x3e6   :  { %vm1013_vm6 = vcmp.eq.s32.totalorder %v1008_v17, 2  ;;  %vm1010_vm7 = vcmp.eq.s32.totalorder %v1008_v17, 0  ;;  %vm1009_vm8 = vcmp.lt.s32.totalorder %v1008_v17, 2  ;;  %v1505_v17 = vld [vmem:[#allocation7 + $0x6c8] sm:$0xff] }
 0x3e7   :  { %v989_v60 = vor.u32 %v988_v59, %v987_v52  ;;  %v992_v55 = vshll.u32 %v991_v53, 23  ;;  %v1979_v62 = vadd.s32 4294967294, %v1086_v33  ;;  %v1481_v53 = vld [vmem:[#allocation7 + $0x608] sm:$0xff] }
 0x3e9   :  { %v993_v36 = vor.u32 4788187, %v992_v55  ;;  %vm1980_vm1 = vcmp.lt.s32.totalorder %v1979_v62, 0  ;;  %v996_v0 = vcvt.s32.f32 %v989_v60  ;;  %v1480_v60 = vld [vmem:[#allocation7 + $0x600] sm:$0xff]  ;;  %v1482_v55 = vld [vmem:[#allocation7 + $0x610] sm:$0xff] }
 0x3ea   :  { %v1089_v57 = vsel %vm1980_vm1, 0, %v1979_v62  ;;  %v2258_v62 = vpack.c.bf16 %v1482_v55, %v1480_v60  ;;  %v1521_v55 = vld [vmem:[#allocation7 + $0x748] sm:$0xff] }
 0x3eb   :  { %v994_v37 = vand.u32 2147483647, %v993_v36  ;;  %v1090_v2 = vsub.s32 32, %v1089_v57  ;;  %v1094_v32 = vsub.s32 4294967266, %v1089_v57  ;;  %v1091_v3 = vshll.u32 %v1082_v41, %v1089_v57  ;;  %v1485_v36 = vld [vmem:[#allocation7 + $0x628] sm:$0xff]  ;;  %v1484_v57 = vld [vmem:[#allocation7 + $0x620] sm:$0xff] }
 0x3ec   :  { %v1112_v41 = vand.u32 3, %v1111_v40  ;;  %v1509_v40 = vld [vmem:[#allocation7 + $0x6e8] sm:$0xff] }
 0x3ed   :  { %v997_v42 = vmul.f32 %v996_v0, %v994_v37  ;;  %v1092_v4 = vshrl.u32 %v1074_v61, %v1090_v2  ;;  %v1095_v63 = vadd.s32 127, %v1094_v32  ;;  %v1487_v37 = vld [vmem:[#allocation7 + $0x638] sm:$0xff]  ;;  %v1486_v61 = vld [vmem:[#allocation7 + $0x630] sm:$0xff] }
 0x3ee   :  { %vm1117_vm10 = vcmp.eq.s32.totalorder %v1112_v41, 2  ;;  %vm1114_vm11 = vcmp.eq.s32.totalorder %v1112_v41, 0  ;;  %vm1113_vm12 = vcmp.lt.s32.totalorder %v1112_v41, 2  ;;  %v2260_v0 = vpack.c.bf16 %v1487_v37, %v1485_v36  ;;  %v1491_v32 = vld [vmem:[#allocation7 + $0x658] sm:$0xff]  ;;  %v1520_v37 = vld [vmem:[#allocation7 + $0x740] sm:$0xff] }
 0x3ef   :  { %v998_v5 = vxor.u32 2147483648, %v997_v42  ;;  %v1093_v6 = vor.u32 %v1092_v4, %v1091_v3  ;;  %v1096_v7 = vshll.u32 %v1095_v63, 23  ;;  %v2262_v2 = vpack.c.bf16 %v1486_v61, %v1484_v57  ;;  %v1490_v3 = vld [vmem:[#allocation7 + $0x650] sm:$0xff]  ;;  %v1493_v63 = vld [vmem:[#allocation7 + $0x668] sm:$0xff] }
 0x3f0   :  { %v2266_v4 = vpack.c.bf16 %v1490_v3, %v1488_v43  ;;  %v1525_v61 = vld [vmem:[#allocation7 + $0x768] sm:$0xff]  ;;  %v1531_v3 = vld [vmem:[#allocation7 + $0x798] sm:$0xff] }
 0x3f1   :  { %v999_v8 = vsel %vm916_vm2, %v998_v5, %v997_v42  ;;  %v1097_v11 = vor.u32 4788187, %v1096_v7  ;;  %v1100_v14 = vcvt.s32.f32 %v1093_v6  ;;  %v1495_v5 = vld [vmem:[#allocation7 + $0x678] sm:$0xff]  ;;  %v1492_v7 = vld [vmem:[#allocation7 + $0x660] sm:$0xff]  ;;  %v1529_v43 = vld [vmem:[#allocation7 + $0x788] sm:$0xff] }
 0x3f2   :  { %v1002_v10 = vsel %vm915_vm3, %v2899_v34, %v999_v8  ;;  %v1483_v34 = vld [vmem:[#allocation7 + $0x618] sm:$0xff]  ;;  %v2268_v6 = vpack.c.bf16 %v1495_v5, %v1493_v63  ;;  %v1494_v8 = vld [vmem:[#allocation7 + $0x670] sm:$0xff]  ;;  %v2304_v63 = vpack.c.bf16 %v1531_v3, %v1529_v43  ;;  %v1528_v5 = vld [vmem:[#allocation7 + $0x780] sm:$0xff] }
 0x3f3   :  { %2425 = vcosq.f32 %v1002_v10  ;;  %v1098_v13 = vand.u32 2147483647, %v1097_v11  ;;  %v2256_v33 = vpack.c.bf16 %v1483_v34, %v1481_v53  ;;  %v2270_v9 = vpack.c.bf16 %v1494_v8, %v1492_v7  ;;  %v1499_v11 = vld [vmem:[#allocation7 + $0x698] sm:$0xff]  ;;  %v1516_v34 = vld [vmem:[#allocation7 + $0x720] sm:$0xff]  ;;  %v1533_v7 = vld [vmem:[#allocation7 + $0x7a8] sm:$0xff] }
 0x3f4   :  { %2427 = vsinq.f32 %v1002_v10  ;;  %v1497_v10 = vld [vmem:[#allocation7 + $0x688] sm:$0xff]  ;;  %v1535_v8 = vld [vmem:[#allocation7 + $0x7b8] sm:$0xff] }
 0x3f5   :  { %v1101_v16 = vmul.f32 %v1100_v14, %v1098_v13  ;;  %2257 = vmatprep.subr.bf16.mxu0 %v2256_v33  ;;  %v2272_v13 = vpack.c.bf16 %v1499_v11, %v1497_v10  ;;  %v1496_v14 = vld [vmem:[#allocation7 + $0x680] sm:$0xff]  ;;  %v1518_v33 = vld [vmem:[#allocation7 + $0x730] sm:$0xff]  ;;  %v2308_v10 = vpack.c.bf16 %v1535_v8, %v1533_v7 }
 0x3f6   :  { %2259 = vmatpush1.bf16.msra.mxu0 %v2258_v62  ;;  %v2294_v60 = vpack.c.bf16 %v1518_v33, %v1516_v34  ;;  %v1523_v62 = vld [vmem:[#allocation7 + $0x758] sm:$0xff]  ;;  %v1532_v11 = vld [vmem:[#allocation7 + $0x7a0] sm:$0xff] }
 0x3f7   :  { %v1102_v15 = vxor.u32 2147483648, %v1101_v16  ;;  %2261 = vmatprep.subr.bf16.mxu0 %v2260_v0  ;;  %v2296_v36 = vpack.c.bf16 %v1523_v62, %v1521_v55  ;;  %v1522_v0 = vld [vmem:[#allocation7 + $0x750] sm:$0xff] }
 0x3f8   :  { %v2298_v57 = vpack.c.bf16 %v1522_v0, %v1520_v37 }
 0x3f9   :  { %v1103_v27 = vsel %vm1020_vm4, %v1102_v15, %v1101_v16  ;;  %v2274_v16 = vpack.c.bf16 %v1498_v29, %v1496_v14  ;;  %v2276_v15 = vpack.c.bf16 %v1503_v46, %v1501_v28  ;;  %v1537_v14 = vld [vmem:[#allocation7 + $0x7c8] sm:$0xff]  ;;  %v1539_v29 = vld [vmem:[#allocation7 + $0x7d8] sm:$0xff]  ;;  %v1536_v46 = vld [vmem:[#allocation7 + $0x7c0] sm:$0xff] }
 0x3fa   :  { %v1106_v12 = vsel %vm1019_vm5, %v2901_v25, %v1103_v27  ;;  %2263 = vmatpush1.bf16.msra.mxu0 %v2262_v2  ;;  %v1489_v25 = vld [vmem:[#allocation7 + $0x648] sm:$0xff]  ;;  %v1500_v27 = vld [vmem:[#allocation7 + $0x6a0] sm:$0xff]  ;;  %v1527_v2 = vld [vmem:[#allocation7 + $0x778] sm:$0xff]  ;;  %v2312_v28 = vpack.c.bf16 %v1539_v29, %v1537_v14 }
 0x3fb   :  { %2429 = vcosq.f32 %v1106_v12  ;;  %v2264_v42 = vpack.c.bf16 %v1491_v32, %v1489_v25  ;;  %v1524_v25 = vld [vmem:[#allocation7 + $0x760] sm:$0xff]  ;;  %v2300_v32 = vpack.c.bf16 %v1527_v2, %v1525_v61 }
 0x3fc   :  { %2431 = vsinq.f32 %v1106_v12  ;;  %v2278_v12 = vpack.c.bf16 %v1502_v35, %v1500_v27  ;;  %v1541_v27 = vld [vmem:[#allocation7 + $0x7e8] sm:$0xff]  ;;  %v1543_v35 = vld [vmem:[#allocation7 + $0x7f8] sm:$0xff] }
 0x3fd   :  { %v2426_v18 = vpop.eup %2425  ;;  %2265 = vmatprep.subr.bf16.mxu0 %v2264_v42  ;;  %v1526_v42 = vld [vmem:[#allocation7 + $0x770] sm:$0xff] }
 0x3fe   :  { %v2428_v21 = vpop.eup %2427  ;;  %v1014_v23 = vxor.u32 2147483648, %v2426_v18  ;;  %2267 = vmatpush1.bf16.msra.mxu0 %v2266_v4  ;;  %v2302_v4 = vpack.c.bf16 %v1526_v42, %v1524_v25 }
 0x3ff   :  { %v1011_v24 = vxor.u32 2147483648, %v2428_v21  ;;  %2269 = vmatprep.subr.bf16.mxu0 %v2268_v6  ;;  %v1530_v6 = vld [vmem:[#allocation7 + $0x790] sm:$0xff] }
 0x400   :  { %v1015_v38 = vsel %vm1013_vm6, %v1014_v23, %v2428_v21  ;;  %v1504_v21 = vld [vmem:[#allocation7 + $0x6c0] sm:$0xff]  ;;  %v1506_v23 = vld [vmem:[#allocation7 + $0x6d0] sm:$0xff] }
 0x401   :  { %v1012_v39 = vsel %vm1010_vm7, %v2426_v18, %v1011_v24  ;;  %v1507_v18 = vld [vmem:[#allocation7 + $0x6d8] sm:$0xff]  ;;  %v2282_v24 = vpack.c.bf16 %v1506_v23, %v1504_v21  ;;  %v1188_v23 = vld [vmem:[#allocation10 + $0x3] ss:$8 sm:$0x3] }
 0x402   :  { %v1016_v26 = vsel %vm1009_vm8, %v1012_v39, %v1015_v38  ;;  %2271 = vmatpush1.bf16.msra.mxu0 %v2270_v9  ;;  %v2280_v19 = vpack.c.bf16 %v1507_v18, %v1505_v17  ;;  %v1511_v38 = vld [vmem:[#allocation7 + $0x6f8] sm:$0xff]  ;;  %v2306_v9 = vpack.c.bf16 %v1530_v6, %v1528_v5  ;;  %v2316_v17 = vpack.c.bf16 %v1543_v35, %v1541_v27  ;;  %v1540_v18 = vld [vmem:[#allocation7 + $0x7e0] sm:$0xff] }
 0x403   :  { %v1017_v30 = vsel %vm1006_vm9, nan, %v1016_v26  ;;  %2273 = vmatprep.subr.bf16.mxu0 %v2272_v13  ;;  %v2284_v39 = vpack.c.bf16 %v1511_v38, %v1509_v40  ;;  %v1508_v26 = vld [vmem:[#allocation7 + $0x6e0] sm:$0xff]  ;;  %v1534_v13 = vld [vmem:[#allocation7 + $0x7b0] sm:$0xff]  ;;  %v1197_v40 = vrot.slane %v1188_v23, %v2711_v22 }
 0x405   :  { %v2430_v44 = vpop.eup %2429 }
 0x406   :  { %v2432_v45 = vpop.eup %2431  ;;  %v1118_v47 = vxor.u32 2147483648, %v2430_v44  ;;  %2275 = vmatpush1.bf16.msra.mxu0 %v2274_v16  ;;  %v2310_v16 = vpack.c.bf16 %v1534_v13, %v1532_v11 }
 0x407   :  { %v1115_v48 = vxor.u32 2147483648, %v2432_v45  ;;  %2277 = vmatprep.subr.bf16.mxu0 %v2276_v15  ;;  %v1538_v15 = vld [vmem:[#allocation7 + $0x7d0] sm:$0xff] }
 0x408   :  { %v1119_v31 = vsel %vm1117_vm10, %v1118_v47, %v2432_v45  ;;  %v1515_v45 = vld [vmem:[#allocation7 + $0x718] sm:$0xff] }
 0x409   :  { %v1116_v50 = vsel %vm1114_vm11, %v2430_v44, %v1115_v48  ;;  %v1513_v44 = vld [vmem:[#allocation7 + $0x708] sm:$0xff]  ;;  %v1512_v48 = vld [vmem:[#allocation7 + $0x700] sm:$0xff] }
 0x40a   :  { %v1120_v52 = vsel %vm1113_vm12, %v1116_v50, %v1119_v31  ;;  %2279 = vmatpush1.bf16.msra.mxu0 %v2278_v12  ;;  %v2288_v47 = vpack.c.bf16 %v1515_v45, %v1513_v44  ;;  %v1514_v31 = vld [vmem:[#allocation7 + $0x710] sm:$0xff]  ;;  %v2314_v12 = vpack.c.bf16 %v1538_v15, %v1536_v46 }
 0x40b   :  { %v1121_v59 = vsel %vm1110_vm13, nan, %v1120_v52  ;;  %2281 = vmatprep.subr.bf16.mxu0 %v2280_v19  ;;  %v2290_v50 = vpack.c.bf16 %v1514_v31, %v1512_v48  ;;  %v1517_v52 = vld [vmem:[#allocation7 + $0x728] sm:$0xff]  ;;  %v1542_v19 = vld [vmem:[#allocation7 + $0x7f0] sm:$0xff] }
 0x40c   :  { %1264 = vmatprep.mubr.f32.mxu1 %v1121_v59  ;;  %v1519_v59 = vld [vmem:[#allocation7 + $0x738] sm:$0xff]  ;;  %v2318_v21 = vpack.c.bf16 %v1542_v19, %v1540_v18 }
 0x40d   :  { %1265 = vmatmul.mubr.f32.vlgmr.msra.gmra.mrb[2].mxu1 %v1017_v30  ;;  %v1510_v30 = vld [vmem:[#allocation7 + $0x6f0] sm:$0xff]  ;;  %v2292_v53 = vpack.c.bf16 %v1519_v59, %v1517_v52 }
 0x40e   :  { %2283 = vmatpush1.bf16.msra.mxu0 %v2282_v24  ;;  %v2286_v41 = vpack.c.bf16 %v1510_v30, %v1508_v26  ;;  %v1193_v24 = vrot.slane %v1188_v23, %v2709_v20 }
 0x40f   :  { %2285 = vmatprep.subr.bf16.mxu0 %v2284_v39 }
 0x412   :  { %2287 = vmatpush1.bf16.msra.mxu0 %v2286_v41 }
 0x413   :  { %2289 = vmatprep.subr.bf16.mxu0 %v2288_v47 }
 0x416   :  { %2291 = vmatpush1.bf16.msra.mxu0 %v2290_v50 }
 0x417   :  { %2293 = vmatprep.subr.bf16.mxu0 %v2292_v53 }
 0x41a   :  { %2295 = vmatpush1.bf16.msra.mxu0 %v2294_v60 }
 0x41b   :  { %2297 = vmatprep.subr.bf16.mxu0 %v2296_v36 }
 0x41e   :  { %2299 = vmatpush1.bf16.msra.mxu0 %v2298_v57 }
 0x41f   :  { %2301 = vmatprep.subr.bf16.mxu0 %v2300_v32 }
 0x422   :  { %2303 = vmatpush1.bf16.msra.mxu0 %v2302_v4 }
 0x423   :  { %2305 = vmatprep.subr.bf16.mxu0 %v2304_v63 }
 0x426   :  { %2307 = vmatpush1.bf16.msra.mxu0 %v2306_v9 }
 0x427   :  { %2309 = vmatprep.subr.bf16.mxu0 %v2308_v10 }
 0x42a   :  { %2311 = vmatpush1.bf16.msra.mxu0 %v2310_v16 }
 0x42b   :  { %2313 = vmatprep.subr.bf16.mxu0 %v2312_v28 }
 0x42e   :  { %2315 = vmatpush1.bf16.msra.mxu0 %v2314_v12 }
 0x42f   :  { %2317 = vmatprep.subr.bf16.mxu0 %v2316_v17 }
 0x432   :  { %2319 = vmatpush1.bf16.msra.mxu0 %v2318_v21 }
 0x4e0   :  { %v1266_v38 = vpop.f32.mrb[2].mxu1 }
 0x4e1   :  { %v2982_v39 = vadd.f32 %v1266_v38, %v1193_v24  ;;  %v1268_v26 = vpop.f32.mrb[3].mxu1 }
 0x4e2   :  { %v2984_v30 = vadd.f32 %v1268_v26, %v1197_v40 }
 0x4e3   :  { %v1271_v41 = vand.u32 2147483647, %v2982_v39  ;;  %v1274_v44 = vand.u32 2139095040, %v2982_v39  ;;  %vm1273_vm12 = vcmp.lt.s32.totalorder %v2982_v39, 0 }
 0x4e4   :  { %v1378_v45 = vand.u32 2139095040, %v2984_v30  ;;  %v1375_v31 = vand.u32 2147483647, %v2984_v30 }
 0x4e5   :  { %v1275_v47 = vshrl.u32 %v1274_v44, 23  ;;  %v1278_v48 = vand.u32 8388607, %v1271_v41  ;;  %vm1272_vm13 = vcmp.le.f32.partialorder %v1271_v41, 0.7853982 }
 0x4e6   :  { %v1379_v50 = vshrl.u32 %v1378_v45, 23  ;;  %v1382_v33 = vand.u32 8388607, %v1375_v31 }
 0x4e7   :  { %v1981_v52 = vadd.s32 4294967169, %v1275_v47  ;;  %v1279_v34 = vor.u32 8388608, %v1278_v48 }
 0x4e8   :  { %v1985_v59 = vadd.s32 4294967169, %v1379_v50  ;;  %v1383_v57 = vor.u32 8388608, %v1382_v33 }
 0x4e9   :  { %v1281_v53 = vadd.s32 1, %v1981_v52  ;;  %v2994_v0 = vshll.u32 %v1279_v34, 8 }
 0x4ea   :  { %v1385_v60 = vadd.s32 1, %v1985_v59 }
 0x4eb   :  { %vm1282_vm14 = vcmp.gt.s32.totalorder %v1281_v53, 0 }
 0x4ec   :  { %v1283_v55 = vsel %vm1282_vm14, %v1281_v53, 0  ;;  %vm1386_vm15 = vcmp.gt.s32.totalorder %v1385_v60, 0  ;;  %vm1377_vm14 = vcmp.lt.s32.totalorder %v2984_v30, 0 }
 0x4ed   :  { %v1284_v62 = vshrl.u32 %v1283_v55, 5  ;;  %v1285_v36 = vand.u32 31, %v1283_v55  ;;  %v1387_v37 = vsel %vm1386_vm15, %v1385_v60, 0  ;;  %vm1376_vm15 = vcmp.le.f32.partialorder %v1375_v31, 0.7853982 }
 0x4ee   :  { %v2997_v25 = vshrl.u32 %v1387_v37, 5  ;;  %v1389_v32 = vand.u32 31, %v1387_v37 }
 0x4ef   :  { %v1286_v61 = vsub.s32 32, %v1285_v36  ;;  %v1288_v2 = vshll.u32 %v2599_v49, %v1285_v36  ;;  %v1291_v42 = vshll.u32 %v2600_v51, %v1285_v36  ;;  %v1294_v43 = vshll.u32 %v2601_v54, %v1285_v36 }
 0x4f0   :  { %v1297_v3 = vshll.u32 %v2602_v56, %v1285_v36  ;;  %v1300_v4 = vshll.u32 %v2603_v58, %v1285_v36  ;;  %vm1303_vm0 = vcmp.lt.s32.totalorder %v1284_v62, 1  ;;  %vm1304_vm1 = vcmp.lt.s32.totalorder %v1284_v62, 2 }
 0x4f1   :  { %v1289_v63 = vshrl.u32 %v2600_v51, %v1286_v61  ;;  %v1292_v5 = vshrl.u32 %v2601_v54, %v1286_v61  ;;  %v1295_v6 = vshrl.u32 %v2602_v56, %v1286_v61  ;;  %v1287_v7 = vshrl.u32 %v2599_v49, %v1286_v61 }
 0x4f2   :  { %v1298_v8 = vshrl.u32 %v2603_v58, %v1286_v61  ;;  %v1301_v9 = vshrl.u32 %v2604_v1, %v1286_v61  ;;  %v1390_v14 = vsub.s32 32, %v1389_v32  ;;  %vm1305_vm2 = vcmp.lt.s32.totalorder %v1284_v62, 3 }
 0x4f3   :  { %v1290_v10 = vor.u32 %v1289_v63, %v1288_v2  ;;  %v1293_v11 = vor.u32 %v1292_v5, %v1291_v42  ;;  %v1296_v13 = vor.u32 %v1295_v6, %v1294_v43  ;;  %vm1306_vm3 = vcmp.lt.s32.totalorder %v1284_v62, 4 }
 0x4f4   :  { %v1299_v29 = vor.u32 %v1298_v8, %v1297_v3  ;;  %v1302_v16 = vor.u32 %v1301_v9, %v1300_v4  ;;  %v1392_v18 = vshll.u32 %v2599_v49, %v1389_v32  ;;  %v1393_v23 = vshrl.u32 %v2600_v51, %v1390_v14 }
 0x4f5   :  { %v1307_v28 = vsel %vm1303_vm0, %v1287_v7, %v1290_v10  ;;  %v1308_v46 = vsel %vm1306_vm3, %v1296_v13, 2102212464  ;;  %v1311_v15 = vsel %vm1303_vm0, %v1290_v10, %v1293_v11  ;;  %v1315_v27 = vsel %vm1303_vm0, %v1293_v11, %v1296_v13 }
 0x4f6   :  { %v1309_v35 = vsel %vm1305_vm2, %v1293_v11, %v1308_v46  ;;  %v1312_v12 = vsel %vm1306_vm3, %v1299_v29, 920167782  ;;  %v1316_v17 = vsel %vm1306_vm3, %v1302_v16, 1326507024  ;;  %v1395_v24 = vshll.u32 %v2600_v51, %v1389_v32 }
 0x4f7   :  { %v1313_v19 = vsel %vm1305_vm2, %v1296_v13, %v1312_v12  ;;  %v1317_v21 = vsel %vm1305_vm2, %v1299_v29, %v1316_v17  ;;  %v1310_v40 = vsel %vm1304_vm1, %v1307_v28, %v1309_v35  ;;  %v1396_v44 = vshrl.u32 %v2601_v54, %v1390_v14 }
 0x4f8   :  { %v1314_v38 = vsel %vm1304_vm1, %v1311_v15, %v1313_v19  ;;  %v1318_v26 = vsel %vm1304_vm1, %v1315_v27, %v1317_v21  ;;  %v1394_v52 = vor.u32 %v1393_v23, %v1392_v18  ;;  %v1398_v53 = vshll.u32 %v2601_v54, %v1389_v32 }
 0x4f9   :  { %v3020_v45 = vmul.u32.u64.low %v2994_v0, %v1318_v26  ;;  %v3021_v47 = vmul.u32.u64.high %v2994_v0, %v1318_v26, %v3020_v45  ;;  %v3024_v48 = vmul.u32.u64.low %v2994_v0, %v1314_v38  ;;  %v3025_v50 = vmul.u32.u64.high %v2994_v0, %v1314_v38, %v3024_v48 }
 0x4fa   :  { %v1397_v59 = vor.u32 %v1396_v44, %v1395_v24  ;;  %v1399_v34 = vshrl.u32 %v2602_v56, %v1390_v14  ;;  %v1401_v33 = vshll.u32 %v2602_v56, %v1389_v32  ;;  %v1402_v60 = vshrl.u32 %v2603_v58, %v1390_v14 }
 0x4fb   :  { %v1405_v55 = vshrl.u32 %v2604_v1, %v1390_v14  ;;  %v1423_v62 = vshll.u32 %v1383_v57, 8  ;;  %v1326_v36 = vmul.u32 %v2994_v0, %v1310_v40  ;;  %v1391_v37 = vshrl.u32 %v2599_v49, %v1390_v14 }
 0x4fc   :  { %v1400_v61 = vor.u32 %v1399_v34, %v1398_v53  ;;  %v1404_v2 = vshll.u32 %v2603_v58, %v1389_v32  ;;  %vm1328_vm4 = vc.u32 %v3021_v47, %v3024_v48  ;;  %v1329_v42 = vadd.s32 1, %v3025_v50 }
 0x4fd   :  { %v1403_v43 = vor.u32 %v1402_v60, %v1401_v33  ;;  %vm1407_vm5 = vcmp.lt.s32.totalorder %v2997_v25, 1  ;;  %vm1409_vm6 = vcmp.lt.s32.totalorder %v2997_v25, 3  ;;  %vm1410_vm7 = vcmp.lt.s32.totalorder %v2997_v25, 4 }
 0x4fe   :  { %v1406_v3 = vor.u32 %v1405_v55, %v1404_v2  ;;  %v1415_v57 = vsel %vm1407_vm5, %v1394_v52, %v1397_v59  ;;  %v1330_v0 = vsel %vm1328_vm4, %v1329_v42, %v3025_v50  ;;  %v1412_v4 = vsel %vm1410_vm7, %v1400_v61, 2102212464 }
 0x4ff   :  { %v1416_v63 = vsel %vm1410_vm7, %v1403_v43, 920167782  ;;  %v1419_v5 = vsel %vm1407_vm5, %v1397_v59, %v1400_v61  ;;  %v1331_v6 = vadd.s32 %v1330_v0, %v1326_v36  ;;  %vm1408_vm8 = vcmp.lt.s32.totalorder %v2997_v25, 2 }
 0x500   :  { %v1417_v32 = vsel %vm1409_vm6, %v1400_v61, %v1416_v63  ;;  %v1420_v7 = vsel %vm1410_vm7, %v1406_v3, 1326507024  ;;  %v1411_v8 = vsel %vm1407_vm5, %v1391_v37, %v1394_v52  ;;  %v1413_v9 = vsel %vm1409_vm6, %v1397_v59, %v1412_v4 }
 0x501   :  { %v1418_v10 = vsel %vm1408_vm8, %v1415_v57, %v1417_v32  ;;  %v1421_v11 = vsel %vm1409_vm6, %v1403_v43, %v1420_v7  ;;  %v1332_v13 = vadd.s32 536870912, %v1331_v6  ;;  %v1414_v27 = vsel %vm1408_vm8, %v1411_v8, %v1413_v9 }
 0x502   :  { %v1422_v14 = vsel %vm1408_vm8, %v1419_v5, %v1421_v11  ;;  %v3042_v29 = vmul.u32.u64.low %v1423_v62, %v1418_v10  ;;  %v3043_v16 = vmul.u32.u64.high %v1423_v62, %v1418_v10, %v3042_v29  ;;  %v1430_v25 = vmul.u32 %v1423_v62, %v1414_v27 }
 0x503   :  { %v3045_v28 = vmul.u32.u64.low %v1423_v62, %v1422_v14  ;;  %v3046_v46 = vmul.u32.u64.high %v1423_v62, %v1422_v14, %v3045_v28  ;;  %v1333_v15 = vshrl.u32 %v1332_v13, 30  ;;  %v1327_v59 = vadd.s32 %v3024_v48, %v3021_v47 }
 0x504   :  { %v1433_v12 = vadd.s32 1, %v3043_v16  ;;  %vm1363_vm3 = vweird.f32 %v2982_v39  ;;  %vm1467_vm7 = vweird.f32 %v2984_v30 }
 0x505   :  { %v1334_v35 = vshll.u32 %v1333_v15, 30  ;;  %vm1432_vm9 = vc.u32 %v3046_v46, %v3042_v29  ;;  %v1431_v0 = vadd.s32 %v3042_v29, %v3046_v46  ;;  %v1357_v48 = vsub.s32 4, %v1333_v15 }
 0x506   :  { %v1434_v18 = vsel %vm1432_vm9, %v1433_v12, %v3043_v16 }
 0x507   :  { %v1335_v17 = vsub.s32 %v1331_v6, %v1334_v35  ;;  %v1435_v19 = vadd.s32 %v1434_v18, %v1430_v25  ;;  %v1358_v11 = vsel %vm1273_vm12, %v1357_v48, %v1333_v15  ;;  %v1840_v48 = vld [vmem:[#allocation8 + $0x20] sm:$0xff] }
 0x508   :  { %v1360_v28 = vsel %vm1272_vm13, 0, %v1358_v11  ;;  %v1860_v11 = vld [vmem:[#allocation8 + $0xc0] sm:$0xff] }
 0x509   :  { %v1337_v21 = vsub.s32 0, %v1335_v17  ;;  %v1436_v23 = vadd.s32 536870912, %v1435_v19  ;;  %v1364_v35 = vadd.s32 3, %v1360_v28  ;;  %v1845_v28 = vld [vmem:[#allocation8 + $0x48] sm:$0xff] }
 0x50b   :  { %v1982_v24 = vmin.u32 %v1337_v21, %v1335_v17  ;;  %v1437_v40 = vshrl.u32 %v1436_v23, 30 }
 0x50d   :  { %v1339_v38 = vclz %v1982_v24  ;;  %v1438_v26 = vshll.u32 %v1437_v40, 30  ;;  %v1461_v27 = vsub.s32 4, %v1437_v40 }
 0x50f   :  { %v1983_v44 = vadd.s32 4294967294, %v1339_v38  ;;  %v1439_v45 = vsub.s32 %v1435_v19, %v1438_v26  ;;  %v1462_v41 = vsel %vm1377_vm14, %v1461_v27, %v1437_v40  ;;  %v1863_v27 = vld [vmem:[#allocation8 + $0xd8] sm:$0xff] }
 0x510   :  { %v1464_v19 = vsel %vm1376_vm15, 0, %v1462_v41  ;;  %v1847_v41 = vld [vmem:[#allocation8 + $0x58] sm:$0xff] }
 0x511   :  { %vm1984_vm10 = vcmp.lt.s32.totalorder %v1983_v44, 0  ;;  %v1441_v52 = vsub.s32 0, %v1439_v45  ;;  %v1468_v38 = vadd.s32 3, %v1464_v19 }
 0x512   :  { %v1342_v50 = vsel %vm1984_vm10, 0, %v1983_v44 }
 0x513   :  { %v1343_v53 = vsub.s32 32, %v1342_v50  ;;  %v1347_v34 = vsub.s32 4294967266, %v1342_v50  ;;  %v1986_v33 = vmin.u32 %v1441_v52, %v1439_v45  ;;  %v1344_v60 = vshll.u32 %v1335_v17, %v1342_v50 }
 0x514   :  { %v1365_v17 = vand.u32 3, %v1364_v35 }
 0x515   :  { %v1345_v55 = vshrl.u32 %v1327_v59, %v1343_v53  ;;  %v1348_v62 = vadd.s32 127, %v1347_v34  ;;  %v1443_v36 = vclz %v1986_v33 }
 0x516   :  { %vm1370_vm0 = vcmp.eq.s32.totalorder %v1365_v17, 2  ;;  %vm1367_vm1 = vcmp.eq.s32.totalorder %v1365_v17, 0  ;;  %vm1366_vm2 = vcmp.lt.s32.totalorder %v1365_v17, 2  ;;  %v1865_v17 = vld [vmem:[#allocation8 + $0xe8] sm:$0xff] }
 0x517   :  { %v1346_v37 = vor.u32 %v1345_v55, %v1344_v60  ;;  %v1349_v61 = vshll.u32 %v1348_v62, 23  ;;  %v1987_v2 = vadd.s32 4294967294, %v1443_v36  ;;  %v1852_v62 = vld [vmem:[#allocation8 + $0x80] sm:$0xff] }
 0x519   :  { %v1350_v42 = vor.u32 4788187, %v1349_v61  ;;  %vm1988_vm11 = vcmp.lt.s32.totalorder %v1987_v2, 0  ;;  %v1353_v3 = vcvt.s32.f32 %v1346_v37  ;;  %v1836_v37 = vld [vmem:[#allocation8] sm:$0xff]  ;;  %v1837_v61 = vld [vmem:[#allocation8 + $0x8] sm:$0xff] }
 0x51a   :  { %v1446_v57 = vsel %vm1988_vm11, 0, %v1987_v2  ;;  %v2322_v2 = vpack.c.bf16 %v1837_v61, %v1836_v37 }
 0x51b   :  { %v1351_v43 = vand.u32 2147483647, %v1350_v42  ;;  %v1447_v4 = vsub.s32 32, %v1446_v57  ;;  %v1451_v63 = vsub.s32 4294967266, %v1446_v57  ;;  %v1448_v5 = vshll.u32 %v1439_v45, %v1446_v57  ;;  %v1854_v42 = vld [vmem:[#allocation8 + $0x90] sm:$0xff] }
 0x51c   :  { %v1469_v45 = vand.u32 3, %v1468_v38  ;;  %v1838_v57 = vld [vmem:[#allocation8 + $0x10] sm:$0xff]  ;;  %v1867_v38 = vld [vmem:[#allocation8 + $0xf8] sm:$0xff] }
 0x51d   :  { %v1354_v47 = vmul.f32 %v1353_v3, %v1351_v43  ;;  %v1449_v6 = vshrl.u32 %v1431_v0, %v1447_v4  ;;  %v1452_v32 = vadd.s32 127, %v1451_v63  ;;  %v1855_v43 = vld [vmem:[#allocation8 + $0x98] sm:$0xff]  ;;  %v1857_v63 = vld [vmem:[#allocation8 + $0xa8] sm:$0xff] }
 0x51e   :  { %vm1474_vm4 = vcmp.eq.s32.totalorder %v1469_v45, 2  ;;  %vm1471_vm5 = vcmp.eq.s32.totalorder %v1469_v45, 0  ;;  %vm1470_vm6 = vcmp.lt.s32.totalorder %v1469_v45, 2  ;;  %v2324_v3 = vpack.c.bf16 %v1855_v43, %v1854_v42  ;;  %v1839_v0 = vld [vmem:[#allocation8 + $0x18] sm:$0xff] }
 0x51f   :  { %v1355_v7 = vxor.u32 2147483648, %v1354_v47  ;;  %v1450_v8 = vor.u32 %v1449_v6, %v1448_v5  ;;  %v1453_v9 = vshll.u32 %v1452_v32, 23  ;;  %v2326_v4 = vpack.c.bf16 %v1839_v0, %v1838_v57  ;;  %v1841_v5 = vld [vmem:[#allocation8 + $0x28] sm:$0xff]  ;;  %v1858_v32 = vld [vmem:[#allocation8 + $0xb0] sm:$0xff] }
 0x520   :  { %v2330_v6 = vpack.c.bf16 %v1841_v5, %v1840_v48 }
 0x521   :  { %v1356_v10 = vsel %vm1273_vm12, %v1355_v7, %v1354_v47  ;;  %v1454_v14 = vor.u32 4788187, %v1453_v9  ;;  %v1457_v16 = vcvt.s32.f32 %v1450_v8  ;;  %v1859_v7 = vld [vmem:[#allocation8 + $0xb8] sm:$0xff]  ;;  %v1842_v8 = vld [vmem:[#allocation8 + $0x30] sm:$0xff] }
 0x522   :  { %v1359_v13 = vsel %vm1272_vm13, %v2982_v39, %v1356_v10  ;;  %v1853_v39 = vld [vmem:[#allocation8 + $0x88] sm:$0xff]  ;;  %v2332_v9 = vpack.c.bf16 %v1859_v7, %v1858_v32  ;;  %v1843_v10 = vld [vmem:[#allocation8 + $0x38] sm:$0xff] }
 0x523   :  { %2433 = vcosq.f32 %v1359_v13  ;;  %v1455_v29 = vand.u32 2147483647, %v1454_v14  ;;  %v2320_v36 = vpack.c.bf16 %v1853_v39, %v1852_v62  ;;  %v2334_v14 = vpack.c.bf16 %v1843_v10, %v1842_v8 }
 0x524   :  { %2435 = vsinq.f32 %v1359_v13  ;;  %v1861_v13 = vld [vmem:[#allocation8 + $0xc8] sm:$0xff] }
 0x525   :  { %v1458_v46 = vmul.f32 %v1457_v16, %v1455_v29  ;;  %2321 = vmatprep.subr.bf16.mxu1 %v2320_v36  ;;  %v2336_v29 = vpack.c.bf16 %v1861_v13, %v1860_v11  ;;  %v1844_v16 = vld [vmem:[#allocation8 + $0x40] sm:$0xff] }
 0x526   :  { %2323 = vmatpush3.bf16.msra.mxu1 %v2322_v2  ;;  %v2338_v35 = vpack.c.bf16 %v1845_v28, %v1844_v16 }
 0x527   :  { %v1459_v12 = vxor.u32 2147483648, %v1458_v46  ;;  %2325 = vmatprep.subr.bf16.mxu1 %v2324_v3 }
 0x529   :  { %v1460_v25 = vsel %vm1377_vm14, %v1459_v12, %v1458_v46  ;;  %v1862_v46 = vld [vmem:[#allocation8 + $0xd0] sm:$0xff] }
 0x52a   :  { %v1463_v15 = vsel %vm1376_vm15, %v2984_v30, %v1460_v25  ;;  %2327 = vmatpush3.bf16.msra.mxu1 %v2326_v4  ;;  %v1856_v30 = vld [vmem:[#allocation8 + $0xa0] sm:$0xff]  ;;  %v2340_v12 = vpack.c.bf16 %v1863_v27, %v1862_v46  ;;  %v1846_v25 = vld [vmem:[#allocation8 + $0x50] sm:$0xff] }
 0x52b   :  { %2437 = vcosq.f32 %v1463_v15  ;;  %v2328_v47 = vpack.c.bf16 %v1857_v63, %v1856_v30 }
 0x52c   :  { %2439 = vsinq.f32 %v1463_v15  ;;  %v1864_v15 = vld [vmem:[#allocation8 + $0xe0] sm:$0xff] }
 0x52d   :  { %v2434_v18 = vpop.eup %2433  ;;  %2329 = vmatprep.subr.bf16.mxu1 %v2328_v47  ;;  %v2344_v19 = vpack.c.bf16 %v1865_v17, %v1864_v15 }
 0x52e   :  { %v2436_v21 = vpop.eup %2435  ;;  %v1371_v23 = vxor.u32 2147483648, %v2434_v18  ;;  %2331 = vmatpush3.bf16.msra.mxu1 %v2330_v6 }
 0x52f   :  { %v1368_v24 = vxor.u32 2147483648, %v2436_v21  ;;  %2333 = vmatprep.subr.bf16.mxu1 %v2332_v9 }
 0x530   :  { %v1372_v26 = vsel %vm1370_vm0, %v1371_v23, %v2436_v21  ;;  %v1848_v21 = vld [vmem:[#allocation8 + $0x60] sm:$0xff]  ;;  %v1849_v23 = vld [vmem:[#allocation8 + $0x68] sm:$0xff] }
 0x531   :  { %v1369_v44 = vsel %vm1367_vm1, %v2434_v18, %v1368_v24  ;;  %v2342_v18 = vpack.c.bf16 %v1847_v41, %v1846_v25  ;;  %v1866_v24 = vld [vmem:[#allocation8 + $0xf0] sm:$0xff] }
 0x532   :  { %v1373_v31 = vsel %vm1366_vm2, %v1369_v44, %v1372_v26  ;;  %2335 = vmatpush3.bf16.msra.mxu1 %v2334_v14  ;;  %v2346_v26 = vpack.c.bf16 %v1849_v23, %v1848_v21  ;;  %v2348_v44 = vpack.c.bf16 %v1867_v38, %v1866_v24 }
 0x533   :  { %v1374_v40 = vsel %vm1363_vm3, nan, %v1373_v31  ;;  %2337 = vmatprep.subr.bf16.mxu1 %v2336_v29  ;;  %v1850_v31 = vld [vmem:[#allocation8 + $0x70] sm:$0xff] }
 0x535   :  { %v2438_v50 = vpop.eup %2437 }
 0x536   :  { %v2440_v52 = vpop.eup %2439  ;;  %v1475_v59 = vxor.u32 2147483648, %v2438_v50  ;;  %2339 = vmatpush3.bf16.msra.mxu1 %v2338_v35 }
 0x537   :  { %v1472_v53 = vxor.u32 2147483648, %v2440_v52  ;;  %2341 = vmatprep.subr.bf16.mxu1 %v2340_v12 }
 0x538   :  { %v1476_v34 = vsel %vm1474_vm4, %v1475_v59, %v2440_v52 }
 0x539   :  { %v1473_v33 = vsel %vm1471_vm5, %v2438_v50, %v1472_v53  ;;  %v1545_v50 = vld [vmem:[#allocation10 + $0x4] ss:$8 sm:$0x3] }
 0x53a   :  { %v1477_v60 = vsel %vm1470_vm6, %v1473_v33, %v1476_v34  ;;  %2343 = vmatpush3.bf16.msra.mxu1 %v2342_v18  ;;  %v1550_v52 = vrot.slane %v1545_v50, %v2709_v20  ;;  %v1554_v59 = vrot.slane %v1545_v50, %v2711_v22 }
 0x53b   :  { %v1478_v55 = vsel %vm1467_vm7, nan, %v1477_v60  ;;  %2345 = vmatprep.subr.bf16.mxu1 %v2344_v19 }
 0x53c   :  { %1621 = vmatprep.mubr.f32.mxu0 %v1478_v55 }
 0x53d   :  { %1622 = vmatmul.mubr.f32.vlgmr.msra.gmra.mrb[4].mxu0 %v1374_v40  ;;  %v1851_v40 = vld [vmem:[#allocation8 + $0x78] sm:$0xff] }
 0x53e   :  { %2347 = vmatpush3.bf16.msra.mxu1 %v2346_v26  ;;  %v2350_v45 = vpack.c.bf16 %v1851_v40, %v1850_v31 }
 0x53f   :  { %2349 = vmatprep.subr.bf16.mxu1 %v2348_v44 }
 0x542   :  { %2351 = vmatpush3.bf16.msra.mxu1 %v2350_v45 }
 0x610   :  { %v1623_v53 = vpop.f32.mrb[4].mxu0 }
 0x611   :  { %v3065_v34 = vadd.f32 %v1623_v53, %v1550_v52  ;;  %v1625_v33 = vpop.f32.mrb[5].mxu0 }
 0x612   :  { %v3067_v60 = vadd.f32 %v1625_v33, %v1554_v59 }
 0x613   :  { %v1628_v55 = vand.u32 2147483647, %v3065_v34  ;;  %v1631_v62 = vand.u32 2139095040, %v3065_v34  ;;  %vm1630_vm6 = vcmp.lt.s32.totalorder %v3065_v34, 0 }
 0x614   :  { %v1735_v39 = vand.u32 2139095040, %v3067_v60  ;;  %v1732_v20 = vand.u32 2147483647, %v3067_v60 }
 0x615   :  { %v1632_v36 = vshrl.u32 %v1631_v62, 23  ;;  %v1635_v37 = vand.u32 8388607, %v1628_v55  ;;  %vm1629_vm7 = vcmp.le.f32.partialorder %v1628_v55, 0.7853982 }
 0x616   :  { %v1736_v61 = vshrl.u32 %v1735_v39, 23  ;;  %v1739_v3 = vand.u32 8388607, %v1732_v20 }
 0x617   :  { %v1989_v22 = vadd.s32 4294967169, %v1632_v36  ;;  %v1636_v43 = vor.u32 8388608, %v1635_v37 }
 0x618   :  { %v1993_v2 = vadd.s32 4294967169, %v1736_v61  ;;  %v1740_v48 = vor.u32 8388608, %v1739_v3 }
 0x619   :  { %v1638_v42 = vadd.s32 1, %v1989_v22  ;;  %v3077_v47 = vshll.u32 %v1636_v43, 8 }
 0x61a   :  { %v1742_v57 = vadd.s32 1, %v1993_v2  ;;  %v1780_v3 = vshll.u32 %v1740_v48, 8 }
 0x61b   :  { %vm1639_vm8 = vcmp.gt.s32.totalorder %v1638_v42, 0 }
 0x61c   :  { %v1640_v0 = vsel %vm1639_vm8, %v1638_v42, 0  ;;  %vm1743_vm9 = vcmp.gt.s32.totalorder %v1742_v57, 0  ;;  %vm1734_vm8 = vcmp.lt.s32.totalorder %v3067_v60, 0 }
 0x61d   :  { %v1641_v4 = vshrl.u32 %v1640_v0, 5  ;;  %v1642_v30 = vand.u32 31, %v1640_v0  ;;  %v1744_v63 = vsel %vm1743_vm9, %v1742_v57, 0  ;;  %vm1733_vm9 = vcmp.le.f32.partialorder %v1732_v20, 0.7853982 }
 0x61e   :  { %v3080_v32 = vshrl.u32 %v1744_v63, 5  ;;  %v1746_v7 = vand.u32 31, %v1744_v63 }
 0x61f   :  { %v1643_v5 = vsub.s32 32, %v1642_v30  ;;  %v1645_v6 = vshll.u32 %v2599_v49, %v1642_v30  ;;  %v1648_v8 = vshll.u32 %v2600_v51, %v1642_v30  ;;  %v1651_v9 = vshll.u32 %v2601_v54, %v1642_v30 }
 0x620   :  { %v1654_v10 = vshll.u32 %v2602_v56, %v1642_v30  ;;  %v1657_v11 = vshll.u32 %v2603_v58, %v1642_v30  ;;  %vm1660_vm10 = vcmp.lt.s32.totalorder %v1641_v4, 1  ;;  %vm1661_vm11 = vcmp.lt.s32.totalorder %v1641_v4, 2 }
 0x621   :  { %v1646_v13 = vshrl.u32 %v2600_v51, %v1643_v5  ;;  %v1649_v14 = vshrl.u32 %v2601_v54, %v1643_v5  ;;  %v1652_v29 = vshrl.u32 %v2602_v56, %v1643_v5  ;;  %v1644_v16 = vshrl.u32 %v2599_v49, %v1643_v5 }
 0x622   :  { %v1655_v28 = vshrl.u32 %v2603_v58, %v1643_v5  ;;  %v1658_v46 = vshrl.u32 %v2604_v1, %v1643_v5  ;;  %v1747_v25 = vsub.s32 32, %v1746_v7  ;;  %vm1662_vm12 = vcmp.lt.s32.totalorder %v1641_v4, 3 }
 0x623   :  { %v1647_v27 = vor.u32 %v1646_v13, %v1645_v6  ;;  %v1650_v35 = vor.u32 %v1649_v14, %v1648_v8  ;;  %v1653_v12 = vor.u32 %v1652_v29, %v1651_v9  ;;  %vm1663_vm13 = vcmp.lt.s32.totalorder %v1641_v4, 4 }
 0x624   :  { %v1656_v41 = vor.u32 %v1655_v28, %v1654_v10  ;;  %v1659_v15 = vor.u32 %v1658_v46, %v1657_v11  ;;  %v1749_v26 = vshll.u32 %v2599_v49, %v1746_v7  ;;  %v1750_v40 = vshrl.u32 %v2600_v51, %v1747_v25 }
 0x625   :  { %v1664_v17 = vsel %vm1660_vm10, %v1644_v16, %v1647_v27  ;;  %v1665_v18 = vsel %vm1663_vm13, %v1653_v12, 2102212464  ;;  %v1668_v19 = vsel %vm1660_vm10, %v1647_v27, %v1650_v35  ;;  %v1672_v21 = vsel %vm1660_vm10, %v1650_v35, %v1653_v12 }
 0x626   :  { %v1666_v23 = vsel %vm1662_vm12, %v1650_v35, %v1665_v18  ;;  %v1669_v24 = vsel %vm1663_vm13, %v1656_v41, 920167782  ;;  %v1673_v38 = vsel %vm1663_vm13, %v1659_v15, 1326507024  ;;  %v1752_v45 = vshll.u32 %v2600_v51, %v1746_v7 }
 0x627   :  { %v1670_v44 = vsel %vm1662_vm12, %v1653_v12, %v1669_v24  ;;  %v1674_v31 = vsel %vm1662_vm12, %v1656_v41, %v1673_v38  ;;  %v1667_v50 = vsel %vm1661_vm11, %v1664_v17, %v1666_v23  ;;  %v1753_v53 = vshrl.u32 %v2601_v54, %v1747_v25 }
 0x628   :  { %v1671_v52 = vsel %vm1661_vm11, %v1668_v19, %v1670_v44  ;;  %v1675_v59 = vsel %vm1661_vm11, %v1672_v21, %v1674_v31  ;;  %v1751_v37 = vor.u32 %v1750_v40, %v1749_v26  ;;  %v1755_v51 = vshll.u32 %v2601_v54, %v1746_v7 }
 0x629   :  { %v3103_v33 = vmul.u32.u64.low %v3077_v47, %v1675_v59  ;;  %v3104_v62 = vmul.u32.u64.high %v3077_v47, %v1675_v59, %v3103_v33  ;;  %v3107_v39 = vmul.u32.u64.low %v3077_v47, %v1671_v52  ;;  %v3108_v36 = vmul.u32.u64.high %v3077_v47, %v1671_v52, %v3107_v39 }
 0x62a   :  { %v1754_v61 = vor.u32 %v1753_v53, %v1752_v45  ;;  %v1756_v22 = vshrl.u32 %v2602_v56, %v1747_v25  ;;  %v1758_v2 = vshll.u32 %v2602_v56, %v1746_v7  ;;  %v1759_v42 = vshrl.u32 %v2603_v58, %v1747_v25 }
 0x62b   :  { %v1762_v43 = vshrl.u32 %v2604_v1, %v1747_v25  ;;  %v1683_v57 = vmul.u32 %v3077_v47, %v1667_v50  ;;  %v1748_v0 = vshrl.u32 %v2599_v49, %v1747_v25  ;;  %v1761_v30 = vshll.u32 %v2603_v58, %v1746_v7 }
 0x62c   :  { %v1757_v4 = vor.u32 %v1756_v22, %v1755_v51  ;;  %vm1685_vm14 = vc.u32 %v3104_v62, %v3107_v39  ;;  %v1686_v54 = vadd.s32 1, %v3108_v36  ;;  %v1760_v63 = vor.u32 %v1759_v42, %v1758_v2 }
 0x62d   :  { %vm1764_vm15 = vcmp.lt.s32.totalorder %v3080_v32, 1  ;;  %v1763_v56 = vor.u32 %v1762_v43, %v1761_v30  ;;  %vm1766_vm0 = vcmp.lt.s32.totalorder %v3080_v32, 3  ;;  %vm1767_vm1 = vcmp.lt.s32.totalorder %v3080_v32, 4 }
 0x62e   :  { %v1772_v1 = vsel %vm1764_vm15, %v1751_v37, %v1754_v61  ;;  %v1687_v47 = vsel %vm1685_vm14, %v1686_v54, %v3108_v36  ;;  %v1769_v48 = vsel %vm1767_vm1, %v1757_v4, 2102212464  ;;  %v1773_v49 = vsel %vm1767_vm1, %v1760_v63, 920167782 }
 0x62f   :  { %v1776_v5 = vsel %vm1764_vm15, %v1754_v61, %v1757_v4  ;;  %v1688_v6 = vadd.s32 %v1687_v47, %v1683_v57  ;;  %vm1765_vm2 = vcmp.lt.s32.totalorder %v3080_v32, 2  ;;  %v1774_v58 = vsel %vm1766_vm0, %v1757_v4, %v1773_v49 }
 0x630   :  { %v1777_v7 = vsel %vm1767_vm1, %v1763_v56, 1326507024  ;;  %v1768_v8 = vsel %vm1764_vm15, %v1748_v0, %v1751_v37  ;;  %v1770_v9 = vsel %vm1766_vm0, %v1754_v61, %v1769_v48  ;;  %v1775_v10 = vsel %vm1765_vm2, %v1772_v1, %v1774_v58 }
 0x631   :  { %v1778_v11 = vsel %vm1766_vm0, %v1760_v63, %v1777_v7  ;;  %v1689_v13 = vadd.s32 536870912, %v1688_v6  ;;  %v3125_v29 = vmul.u32.u64.low %v1780_v3, %v1775_v10  ;;  %v3126_v16 = vmul.u32.u64.high %v1780_v3, %v1775_v10, %v3125_v29 }
 0x632   :  { %v1779_v14 = vsel %vm1765_vm2, %v1776_v5, %v1778_v11  ;;  %v1771_v35 = vsel %vm1765_vm2, %v1768_v8, %v1770_v9  ;;  %v1684_v45 = vadd.s32 %v3107_v39, %v3104_v62  ;;  %vm1720_vm13 = vweird.f32 %v3065_v34 }
 0x633   :  { %v3128_v28 = vmul.u32.u64.low %v1780_v3, %v1779_v14  ;;  %v3129_v46 = vmul.u32.u64.high %v1780_v3, %v1779_v14, %v3128_v28  ;;  %v1690_v27 = vshrl.u32 %v1689_v13, 30  ;;  %v1790_v25 = vadd.s32 1, %v3126_v16 }
 0x634   :  { %v1787_v32 = vmul.u32 %v1780_v3, %v1771_v35  ;;  %vm1824_vm1 = vweird.f32 %v3067_v60 }
 0x635   :  { %v1691_v12 = vshll.u32 %v1690_v27, 30  ;;  %vm1789_vm3 = vc.u32 %v3129_v46, %v3125_v29  ;;  %v1788_v57 = vadd.s32 %v3125_v29, %v3129_v46  ;;  %v1714_v39 = vsub.s32 4, %v1690_v27 }
 0x636   :  { %v1791_v15 = vsel %vm1789_vm3, %v1790_v25, %v3126_v16 }
 0x637   :  { %v1692_v41 = vsub.s32 %v1688_v6, %v1691_v12  ;;  %v1792_v17 = vadd.s32 %v1791_v15, %v1787_v32  ;;  %v1715_v49 = vsel %vm1630_vm6, %v1714_v39, %v1690_v27 }
 0x638   :  { %v1717_v8 = vsel %vm1629_vm7, 0, %v1715_v49 }
 0x639   :  { %v1694_v18 = vsub.s32 0, %v1692_v41  ;;  %v1793_v19 = vadd.s32 536870912, %v1792_v17  ;;  %v1721_v11 = vadd.s32 3, %v1717_v8 }
 0x63b   :  { %v1990_v21 = vmin.u32 %v1694_v18, %v1692_v41  ;;  %v1794_v23 = vshrl.u32 %v1793_v19, 30  ;;  %v1722_v16 = vand.u32 3, %v1721_v11 }
 0x63d   :  { %v1696_v24 = vclz %v1990_v21  ;;  %v1795_v38 = vshll.u32 %v1794_v23, 30  ;;  %v1818_v10 = vsub.s32 4, %v1794_v23  ;;  %vm1727_vm10 = vcmp.eq.s32.totalorder %v1722_v16, 2 }
 0x63e   :  { %vm1724_vm11 = vcmp.eq.s32.totalorder %v1722_v16, 0  ;;  %vm1723_vm12 = vcmp.lt.s32.totalorder %v1722_v16, 2 }
 0x63f   :  { %v1991_v26 = vadd.s32 4294967294, %v1696_v24  ;;  %v1796_v44 = vsub.s32 %v1792_v17, %v1795_v38  ;;  %v1819_v55 = vsel %vm1734_vm8, %v1818_v10, %v1794_v23 }
 0x640   :  { %v1821_v46 = vsel %vm1733_vm9, 0, %v1819_v55 }
 0x641   :  { %vm1992_vm4 = vcmp.lt.s32.totalorder %v1991_v26, 0  ;;  %v1798_v40 = vsub.s32 0, %v1796_v44  ;;  %v1825_v25 = vadd.s32 3, %v1821_v46 }
 0x642   :  { %v1699_v31 = vsel %vm1992_vm4, 0, %v1991_v26 }
 0x643   :  { %v1700_v50 = vsub.s32 32, %v1699_v31  ;;  %v1704_v52 = vsub.s32 4294967266, %v1699_v31  ;;  %v1994_v59 = vmin.u32 %v1798_v40, %v1796_v44  ;;  %v1701_v53 = vshll.u32 %v1692_v41, %v1699_v31 }
 0x644   :  { %v1826_v17 = vand.u32 3, %v1825_v25 }
 0x645   :  { %v1702_v33 = vshrl.u32 %v1684_v45, %v1700_v50  ;;  %v1705_v36 = vadd.s32 127, %v1704_v52  ;;  %v1800_v37 = vclz %v1994_v59 }
 0x646   :  { %vm1831_vm14 = vcmp.eq.s32.totalorder %v1826_v17, 2  ;;  %vm1828_vm15 = vcmp.eq.s32.totalorder %v1826_v17, 0  ;;  %vm1827_vm0 = vcmp.lt.s32.totalorder %v1826_v17, 2 }
 0x647   :  { %v1703_v61 = vor.u32 %v1702_v33, %v1701_v53  ;;  %v1706_v51 = vshll.u32 %v1705_v36, 23  ;;  %v1995_v22 = vadd.s32 4294967294, %v1800_v37 }
 0x649   :  { %v1707_v2 = vor.u32 4788187, %v1706_v51  ;;  %vm1996_vm5 = vcmp.lt.s32.totalorder %v1995_v22, 0  ;;  %v1710_v43 = vcvt.s32.f32 %v1703_v61 }
 0x64a   :  { %v1803_v3 = vsel %vm1996_vm5, 0, %v1995_v22 }
 0x64b   :  { %v1708_v42 = vand.u32 2147483647, %v1707_v2  ;;  %v1804_v0 = vsub.s32 32, %v1803_v3  ;;  %v1808_v4 = vsub.s32 4294967266, %v1803_v3  ;;  %v1805_v30 = vshll.u32 %v1796_v44, %v1803_v3 }
 0x64d   :  { %v1711_v62 = vmul.f32 %v1710_v43, %v1708_v42  ;;  %v1806_v54 = vshrl.u32 %v1788_v57, %v1804_v0  ;;  %v1809_v63 = vadd.s32 127, %v1808_v4 }
 0x64f   :  { %v1712_v56 = vxor.u32 2147483648, %v1711_v62  ;;  %v1807_v1 = vor.u32 %v1806_v54, %v1805_v30  ;;  %v1810_v47 = vshll.u32 %v1809_v63, 23 }
 0x651   :  { %v1713_v48 = vsel %vm1630_vm6, %v1712_v56, %v1711_v62  ;;  %v1811_v6 = vor.u32 4788187, %v1810_v47  ;;  %v1814_v7 = vcvt.s32.f32 %v1807_v1 }
 0x652   :  { %v1716_v5 = vsel %vm1629_vm7, %v3065_v34, %v1713_v48  ;;  %v1868_v34 = vld [vmem:[#allocation10 + $0x5] ss:$0 sm:$0xff] }
 0x653   :  { %2441 = vcosq.f32 %v1716_v5  ;;  %v1812_v58 = vand.u32 2147483647, %v1811_v6 }
 0x654   :  { %2443 = vsinq.f32 %v1716_v5 }
 0x655   :  { %v1815_v9 = vmul.f32 %v1814_v7, %v1812_v58 }
 0x657   :  { %v1816_v13 = vxor.u32 2147483648, %v1815_v9 }
 0x659   :  { %v1817_v14 = vsel %vm1734_vm8, %v1816_v13, %v1815_v9 }
 0x65a   :  { %v1820_v29 = vsel %vm1733_vm9, %v3067_v60, %v1817_v14 }
 0x65b   :  { %2445 = vcosq.f32 %v1820_v29 }
 0x65c   :  { %2447 = vsinq.f32 %v1820_v29 }
 0x65d   :  { %v2442_v28 = vpop.eup %2441 }
 0x65e   :  { %v2444_v27 = vpop.eup %2443  ;;  %v1728_v35 = vxor.u32 2147483648, %v2442_v28 }
 0x65f   :  { %v1725_v12 = vxor.u32 2147483648, %v2444_v27 }
 0x660   :  { %v1729_v32 = vsel %vm1727_vm10, %v1728_v35, %v2444_v27 }
 0x661   :  { %v1726_v41 = vsel %vm1724_vm11, %v2442_v28, %v1725_v12 }
 0x662   :  { %v1730_v20 = vsel %vm1723_vm12, %v1726_v41, %v1729_v32 }
 0x663   :  { %v1731_v15 = vsel %vm1720_vm13, nan, %v1730_v20 }
 0x665   :  { %v2446_v18 = vpop.eup %2445 }
 0x666   :  { %v2448_v19 = vpop.eup %2447  ;;  %v1832_v21 = vxor.u32 2147483648, %v2446_v18 }
 0x667   :  { %v1829_v23 = vxor.u32 2147483648, %v2448_v19 }
 0x668   :  { %v1833_v24 = vsel %vm1831_vm14, %v1832_v21, %v2448_v19 }
 0x669   :  { %v1830_v38 = vsel %vm1828_vm15, %v2446_v18, %v1829_v23 }
 0x66a   :  { %v1834_v26 = vsel %vm1827_vm0, %v1830_v38, %v1833_v24 }
 0x66b   :  { %v1835_v44 = vsel %vm1824_vm1, nan, %v1834_v26 }
 0x66c   :  { %1933 = vmatprep.mubr.f32.mxu1 %v1835_v44 }
 0x66d   :  { %1934 = vmatmul.mubr.f32.vlgmr.msra.gmra.mrb[4].mxu1 %v1731_v15 }
 0x740   :  { %v2029_v31 = vpop.f32.mrb[4].mxu1 }
 0x741   :  { %v2030_v40 = vpop.f32.mrb[5].mxu1 }
 0x742   :  { %v2031_v45 = vadd.f32 %v2030_v40, %v2029_v31 }
 0x744   :  { %v1936_v50 = vadd.f32 %v2031_v45, %v1868_v34 }
 0x746   :  { %1939 = vst [vmem:[#allocation11] sm:$0xff] %v1936_v50 }
 0x747   :  { %2570 = shalt.err (!%p2567_p2)
}
 0x748   :  { %s2571_s3 = scalar_lea.hbm %s3163_s5, 128 }
 0x749   :  { %p2572_p3 = scmp.ne.s32.totalorder %s3163_s5, %s2571_s3  ;;  %p2575_p4 = scmp.lt.u32.totalorder %s2571_s3, %s3163_s5 }
 0x74b   :  { %p2577_p5 = pnand %p2575_p4, %p2572_p3 }
 0x74d   :  { %2580 = shalt.err (!%p2577_p5)
}
 0x74e   :  { %1949 = dma.vmem_to_hbm [thread:$0]  %s1947_s29, 128, %s3163_s5, [#allocation4]  }
 0x74f   :  { %2587 = dma.done.wait [#allocation4], 128  }
 0x750   :  { %2588 = vsyncadd [#allocation4], 4294967168 }
 0x751   :  { %1953 = vsyncpa [#allocation3], 1 }
 0x752   :  { %1954 = vsyncpa [#allocation6], 1 }
 0x753   :  { %1955 = vsyncpa [#allocation9], 1 }
 0x754   :  { %1956 = vsyncpa [#allocation4], 1 }

</bundles_post_ra>
